<compile_context>
chip_gen: v6e
topology: v6e:2x2x1
jax: 0.10.0
libtpu: 0.0.40
codegen_flags: <defaults>
</compile_context>

<pallas_src>
import functools

import jax
import jax.numpy as jnp
from jax.experimental import pallas as pl
from jax.experimental.pallas import tpu as pltpu

N_BLOCKS = 5  # Decoder has block0..block4


# --------------------------------------------------------------------------
# Kernel
# --------------------------------------------------------------------------
def decoder_kernel(
    p_ref,      # (1, D, Tt)        points, T on lanes
    bias_ref,   # (1, H, 1)         bp + fc_z(z) + fc_c(c)   (per batch)
    wp_ref,     # (H, D)            fc_p weight (out, in), f32
    w0s_ref,    # (N_BLOCKS, H, H)  resnet fc_0 weights (out, in), f32 or bf16
    b0s_ref,    # (N_BLOCKS, H, 1)  f32
    w1s_ref,    # (N_BLOCKS, H, H)  resnet fc_1 weights (out, in), f32 or bf16
    b1s_ref,    # (N_BLOCKS, H, 1)  f32
    wo_ref,     # (H, 1)            fc_out weight (column), f32
    bo_ref,     # (1, 1)            f32
    out_ref,    # (1, 1, Tt)
):
    p_t = p_ref[0]                 # (D, Tt)
    wp = wp_ref[...]               # (H, D)
    d_in = p_t.shape[0]
    mm_dtype = w0s_ref.dtype       # matmul operand dtype (f32 or bf16)

    # net = fc_p(p) + fc_z(z) + fc_c(c)   (all biases pre-combined per batch).
    # K = D = 3 is far too small for the MXU -> three rank-1 VPU FMAs.
    net = bias_ref[0]              # (H, 1) -> broadcasts to (H, Tt)
    for d in range(d_in):
        net = net + wp[:, d:d + 1] * p_t[d:d + 1, :]

    # ResnetBlockFC x5:  x + fc_1(relu(fc_0(relu(x))))   in (H, Tt) layout.
    # Weight slices at static indices are zero-cost ref views; matmul operands
    # are cast to the weight dtype, accumulation stays f32.
    for i in range(N_BLOCKS):
        h = jnp.maximum(net, 0.0).astype(mm_dtype)
        h = (jnp.dot(w0s_ref[i], h, preferred_element_type=jnp.float32)
             + b0s_ref[i])
        h = jnp.maximum(h, 0.0).astype(mm_dtype)
        net = net + (jnp.dot(w1s_ref[i], h, preferred_element_type=jnp.float32)
                     + b1s_ref[i])

    # fc_out off the MXU: (H,1) scale (VPU) + cross-sublane reduce (XLU) ->
    # lane-dense (1, Tt) row.  Avoids streaming Tt through the MXU for 1 row.
    out = (jnp.sum(wo_ref[...] * jnp.maximum(net, 0.0), axis=0, keepdims=True)
           + bo_ref[...])
    out_ref[0] = out.astype(out_ref.dtype)


# --------------------------------------------------------------------------
# Tiling / VMEM helpers
# --------------------------------------------------------------------------
def _vmem_budget_bytes():
    """Per-generation VMEM budget (v5e/v6e 128 MiB, v7x 64 MiB physical)."""
    try:
        info = pltpu.get_tpu_info()
        cap = getattr(info, "vmem_capacity_bytes", None)
        if cap:
            return int(cap * 0.6)
    except Exception:  # noqa: BLE001 - trace-time query may be unavailable
        pass
    return 48 * 1024 * 1024  # conservative default (fits v7x's 64 MiB)


def _pad8(x):
    return ((x + 7) // 8) * 8


def _pick_t_tile(T, H, budget_bytes):
    # Rough per-lane-column f32 footprint: net + 2 temps + p/out double buffers.
    per_col = (3 * _pad8(H) + 4 * 8) * 4
    cap = max(128, budget_bytes // per_col)
    if T <= cap:
        return T
    t = (min(cap, T) // 128) * 128
    while t > 128 and T % t != 0:
        t -= 128
    return t


# --------------------------------------------------------------------------
# Wrapper
# --------------------------------------------------------------------------
@functools.partial(jax.jit, static_argnames=("t_tile", "use_bf16"))
def decoder_forward(p, z, c, params, *, t_tile=None, use_bf16=None):
    B, T, D = p.shape
    H = params["wp"].shape[0]

    # bf16 MXU operands only pay off once the matmuls actually use the MXU
    # array (H >= 128); at tiny H the kernel is overhead/VPU bound anyway.
    if use_bf16 is None:
        use_bf16 = H >= 128
    w_dtype = jnp.bfloat16 if use_bf16 else jnp.float32
    w_itemsize = 2 if use_bf16 else 4

    budget = _vmem_budget_bytes()
    weight_bytes = (2 * N_BLOCKS * H * H * w_itemsize
                    + (H * D + 2 * N_BLOCKS * H + H + 1) * 4)
    if t_tile is None:
        t_tile = _pick_t_tile(T, H, max(budget - weight_bytes, 8 * 1024 * 1024))
    assert T % t_tile == 0
    assert t_tile == T or t_tile % 128 == 0, (
        "partial T tiles must be lane-aligned (multiple of 128)")

    # T on the lane axis for the kernel.
    # TODO(synk): upstream callers could provide p as (B, D, T) to drop this
    # HBM round-trip entirely; negligible once H >= 128 (compute bound).
    p_t = jnp.swapaxes(p, 1, 2)                      # (B, D, T)

    # Per-batch combined bias: bp + fc_z(z) + fc_c(c)  (hoisted out of kernel).
    hp = jax.lax.Precision.HIGHEST
    zb = jnp.dot(z, params["wz"].T, precision=hp) + params["bz"]
    cb = jnp.dot(c, params["wc"].T, precision=hp) + params["bc"]
    bias_b3 = (params["bp"][None, :] + zb + cb)[:, :, None]   # (B, H, 1)

    wp = params["wp"]                                 # (H, D) f32 (VPU path)
    w0s = params["w0s"].astype(w_dtype)               # (N, H, H)
    w1s = params["w1s"].astype(w_dtype)               # (N, H, H)
    b0s3 = params["b0s"][..., None]                   # (N, H, 1) f32
    b1s3 = params["b1s"][..., None]                   # (N, H, 1) f32
    wo_col = params["wo"].reshape(H, 1)               # (H, 1)  f32 (VPU path)
    bo2 = params["bo"].reshape(1, 1)                  # (1, 1)

    grid = (B, T // t_tile)

    def const_spec(arr):
        # Grid-invariant input: constant index_map + single-buffered (halves
        # its VMEM footprint vs the default double buffering).
        n = arr.ndim
        return pl.BlockSpec(arr.shape, lambda b, t, n=n: (0,) * n,
                            pipeline_mode=pl.Buffered(1))

    in_specs = [
        pl.BlockSpec((1, D, t_tile), lambda b, t: (b, 0, t)),   # p (transposed)
        pl.BlockSpec((1, H, 1), lambda b, t: (b, 0, 0)),        # combined bias
        const_spec(wp),
        const_spec(w0s), const_spec(b0s3),
        const_spec(w1s), const_spec(b1s3),
        const_spec(wo_col), const_spec(bo2),
    ]

    # Advisory cost estimate so XLA schedules the wrapper ops sensibly.
    flops = B * T * (2 * H * D + N_BLOCKS * 2 * (2 * H * H) + 2 * H)
    bytes_accessed = (p.size + B * T + B * H) * 4 + weight_bytes
    cost = pl.CostEstimate(flops=int(flops), transcendentals=0,
                           bytes_accessed=int(bytes_accessed))

    # Explicit VMEM limit: single-buffered weights + double-buffered I/O tiles
    # + f32 activation temps, with headroom; never below 32 MiB, never above
    # the per-generation budget.
    act_bytes = 3 * _pad8(H) * t_tile * 4
    io_bytes = 2 * (_pad8(D) * t_tile + _pad8(H) * 128 + _pad8(1) * t_tile) * 4
    vmem_est = weight_bytes + act_bytes + io_bytes
    vmem_limit = int(max(32 * 1024 * 1024, min(budget, 2 * vmem_est)))

    out = pl.pallas_call(
        decoder_kernel,
        out_shape=jax.ShapeDtypeStruct((B, 1, T), jnp.float32),
        grid_spec=pltpu.PrefetchScalarGridSpec(
            num_scalar_prefetch=0,
            grid=grid,
            in_specs=in_specs,
            out_specs=pl.BlockSpec((1, 1, t_tile), lambda b, t: (b, 0, t)),
        ),
        compiler_params=pltpu.CompilerParams(
            dimension_semantics=("parallel", "parallel"),
            vmem_limit_bytes=vmem_limit,
        ),
        cost_estimate=cost,
    )(
        p_t, bias_b3,
        wp,
        w0s, b0s3,
        w1s, b1s3,
        wo_col, bo2,
    )
    return out[:, 0, :]                               # (B, T)


# --------------------------------------------------------------------------
# Pure-JAX reference (mirrors the PyTorch forward; weights are (out, in))
# --------------------------------------------------------------------------
def decoder_reference(p, z, c, params):
    with jax.default_matmul_precision("highest"):
        net = p @ params["wp"].T + params["bp"]
        net = net + (z @ params["wz"].T + params["bz"])[:, None, :]
        net = net + (c @ params["wc"].T + params["bc"])[:, None, :]
        for i in range(N_BLOCKS):
            h = jax.nn.relu(net)
            h = h @ params["w0s"][i].T + params["b0s"][i]
            h = jax.nn.relu(h)
            dx = h @ params["w1s"][i].T + params["b1s"][i]
            net = net + dx
        out = jax.nn.relu(net) @ params["wo"].T + params["bo"]
    return out[..., 0]


# --------------------------------------------------------------------------
# Deterministic parameter init (synthetic — no checkpoint load)
# PyTorch-style layout: weights (out_features, in_features), biases (out,).
# --------------------------------------------------------------------------
def init_params(key, dim, z_dim, c_dim, hidden):
    ks = jax.random.split(key, 12)
    s = 0.1
    return {
        "wp": jax.random.normal(ks[0], (hidden, dim), jnp.float32) * s,
        "bp": jax.random.normal(ks[1], (hidden,), jnp.float32) * s,
        "wz": jax.random.normal(ks[2], (hidden, z_dim), jnp.float32) * s,
        "bz": jax.random.normal(ks[3], (hidden,), jnp.float32) * s,
        "wc": jax.random.normal(ks[4], (hidden, c_dim), jnp.float32) * s,
        "bc": jax.random.normal(ks[5], (hidden,), jnp.float32) * s,
        # Note: PyTorch's ResnetBlockFC zero-inits fc_1; random here so the
        # blocks actually exercise both matmuls.
        "w0s": jax.random.normal(ks[6], (N_BLOCKS, hidden, hidden), jnp.float32) * s,
        "b0s": jax.random.normal(ks[7], (N_BLOCKS, hidden), jnp.float32) * s,
        "w1s": jax.random.normal(ks[8], (N_BLOCKS, hidden, hidden), jnp.float32) * s,
        "b1s": jax.random.normal(ks[9], (N_BLOCKS, hidden), jnp.float32) * s,
        "wo": jax.random.normal(ks[10], (1, hidden), jnp.float32) * s,
        "bo": jax.random.normal(ks[11], (1,), jnp.float32) * s,
    }


if __name__ == "__main__":
    # Small shapes consistent with the module: dim=3 points, latent dims 32,
    # hidden 32, batch 2, T=256 query points.
    B, T, D = 2, 256, 3
    Z_DIM, C_DIM, HIDDEN = 32, 32, 32

    key = jax.random.PRNGKey(0)
    kp, kz, kc, kw = jax.random.split(key, 4)

    p = jax.random.normal(kp, (B, T, D), jnp.float32)
    z = jax.random.normal(kz, (B, Z_DIM), jnp.float32)
    c = jax.random.normal(kc, (B, C_DIM), jnp.float32)
    params = init_params(kw, D, Z_DIM, C_DIM, HIDDEN)

    ref = decoder_reference(p, z, c, params)

    # Default: auto tile (whole T here -> grid (B, 1), overhead-amortized).
    out = jax.block_until_ready(decoder_forward(p, z, c, params))
    assert out.shape == (B, T), out.shape
    err = float(jnp.max(jnp.abs(out - ref)))
    assert jnp.allclose(out, ref, atol=3e-3, rtol=3e-3), err

    # Also exercise the multi-tile path (grid (B, 2)).
    out_tiled = jax.block_until_ready(decoder_forward(p, z, c, params, t_tile=128))
    err_t = float(jnp.max(jnp.abs(out_tiled - ref)))
    assert jnp.allclose(out_tiled, ref, atol=3e-3, rtol=3e-3), err_t

    print("KERNEL_OK")
</pallas_src>

<mosaic_0001>
module attributes {stable_mosaic.version = 11 : i64} {
  func.func @decoder_kernel(%arg0: i32, %arg1: i32, %arg2: memref<1x3x256xf32, #tpu.memory_space<vmem>>, %arg3: memref<1x32x1xf32, #tpu.memory_space<vmem>>, %arg4: memref<32x3xf32, #tpu.memory_space<vmem>>, %arg5: memref<5x32x32xf32, #tpu.memory_space<vmem>>, %arg6: memref<5x32x1xf32, #tpu.memory_space<vmem>>, %arg7: memref<5x32x32xf32, #tpu.memory_space<vmem>>, %arg8: memref<5x32x1xf32, #tpu.memory_space<vmem>>, %arg9: memref<32x1xf32, #tpu.memory_space<vmem>>, %arg10: memref<1x1xf32, #tpu.memory_space<vmem>>, %arg11: memref<1x1x256xf32, #tpu.memory_space<vmem>>) attributes {dimension_semantics = [#tpu.dimension_semantics<parallel>, #tpu.dimension_semantics<parallel>], iteration_bounds = array<i64: 2, 1>, scalar_prefetch = 0 : i64, scratch_operands = 0 : i64, tpu.core_type = #tpu.core_type<tc>, window_params = [{transform_indices = @transform_0, window_bounds = array<i64: 1, 3, 256>}, {transform_indices = @transform_1, window_bounds = array<i64: 1, 32, 1>}, {pipeline_mode = #tpu.pipeline_mode<synchronous>, transform_indices = @transform_2, window_bounds = array<i64: 32, 3>}, {pipeline_mode = #tpu.pipeline_mode<synchronous>, transform_indices = @transform_3, window_bounds = array<i64: 5, 32, 32>}, {pipeline_mode = #tpu.pipeline_mode<synchronous>, transform_indices = @transform_4, window_bounds = array<i64: 5, 32, 1>}, {pipeline_mode = #tpu.pipeline_mode<synchronous>, transform_indices = @transform_5, window_bounds = array<i64: 5, 32, 32>}, {pipeline_mode = #tpu.pipeline_mode<synchronous>, transform_indices = @transform_6, window_bounds = array<i64: 5, 32, 1>}, {pipeline_mode = #tpu.pipeline_mode<synchronous>, transform_indices = @transform_7, window_bounds = array<i64: 32, 1>}, {pipeline_mode = #tpu.pipeline_mode<synchronous>, transform_indices = @transform_8, window_bounds = array<i64: 1, 1>}, {transform_indices = @transform_9, window_bounds = array<i64: 1, 1, 256>}]} {
    %c0 = arith.constant 0 : index
    %c0_0 = arith.constant 0 : index
    %c0_1 = arith.constant 0 : index
    %0 = vector.load %arg2[%c0, %c0_0, %c0_1] : memref<1x3x256xf32, #tpu.memory_space<vmem>>, vector<1x3x256xf32>
    %1 = vector.shape_cast %0 : vector<1x3x256xf32> to vector<3x256xf32>
    %c0_2 = arith.constant 0 : index
    %c0_3 = arith.constant 0 : index
    %2 = vector.load %arg4[%c0_2, %c0_3] : memref<32x3xf32, #tpu.memory_space<vmem>>, vector<32x3xf32>
    %c0_4 = arith.constant 0 : index
    %c0_5 = arith.constant 0 : index
    %c0_6 = arith.constant 0 : index
    %3 = vector.load %arg3[%c0_4, %c0_5, %c0_6] : memref<1x32x1xf32, #tpu.memory_space<vmem>>, vector<1x32x1xf32>
    %4 = vector.shape_cast %3 : vector<1x32x1xf32> to vector<32x1xf32>
    %5 = vector.extract_strided_slice %2 {offsets = [0, 0], sizes = [32, 1], strides = [1, 1]} : vector<32x3xf32> to vector<32x1xf32>
    %6 = vector.extract_strided_slice %1 {offsets = [0, 0], sizes = [1, 256], strides = [1, 1]} : vector<3x256xf32> to vector<1x256xf32>
    %7 = vector.broadcast %5 : vector<32x1xf32> to vector<32x256xf32>
    %8 = vector.broadcast %6 : vector<1x256xf32> to vector<32x256xf32>
    %9 = arith.mulf %7, %8 : vector<32x256xf32>
    %10 = vector.broadcast %4 : vector<32x1xf32> to vector<32x256xf32>
    %11 = arith.addf %10, %9 : vector<32x256xf32>
    %12 = vector.extract_strided_slice %2 {offsets = [0, 1], sizes = [32, 1], strides = [1, 1]} : vector<32x3xf32> to vector<32x1xf32>
    %13 = vector.extract_strided_slice %1 {offsets = [1, 0], sizes = [1, 256], strides = [1, 1]} : vector<3x256xf32> to vector<1x256xf32>
    %14 = vector.broadcast %12 : vector<32x1xf32> to vector<32x256xf32>
    %15 = vector.broadcast %13 : vector<1x256xf32> to vector<32x256xf32>
    %16 = arith.mulf %14, %15 : vector<32x256xf32>
    %17 = arith.addf %11, %16 : vector<32x256xf32>
    %18 = vector.extract_strided_slice %2 {offsets = [0, 2], sizes = [32, 1], strides = [1, 1]} : vector<32x3xf32> to vector<32x1xf32>
    %19 = vector.extract_strided_slice %1 {offsets = [2, 0], sizes = [1, 256], strides = [1, 1]} : vector<3x256xf32> to vector<1x256xf32>
    %20 = vector.broadcast %18 : vector<32x1xf32> to vector<32x256xf32>
    %21 = vector.broadcast %19 : vector<1x256xf32> to vector<32x256xf32>
    %22 = arith.mulf %20, %21 : vector<32x256xf32>
    %23 = arith.addf %17, %22 : vector<32x256xf32>
    %cst = arith.constant 0.000000e+00 : f32
    %24 = vector.broadcast %cst : f32 to vector<32x256xf32>
    %25 = arith.maximumf %23, %24 : vector<32x256xf32>
    %c0_7 = arith.constant 0 : index
    %c0_8 = arith.constant 0 : index
    %c0_9 = arith.constant 0 : index
    %26 = vector.load %arg5[%c0_7, %c0_8, %c0_9] : memref<5x32x32xf32, #tpu.memory_space<vmem>>, vector<1x32x32xf32>
    %27 = vector.shape_cast %26 : vector<1x32x32xf32> to vector<32x32xf32>
    %cst_10 = arith.constant dense<0.000000e+00> : vector<32x256xf32>
    %28 = tpu.matmul %27, %25, %cst_10 {dimension_numbers = #tpu.dot_dimension_numbers<[1], [0], [0], [1], [0, 0, 1, 1], [], []>} : vector<32x32xf32>, vector<32x256xf32>, vector<32x256xf32> -> vector<32x256xf32>
    %c0_11 = arith.constant 0 : index
    %c0_12 = arith.constant 0 : index
    %c0_13 = arith.constant 0 : index
    %29 = vector.load %arg6[%c0_11, %c0_12, %c0_13] : memref<5x32x1xf32, #tpu.memory_space<vmem>>, vector<1x32x1xf32>
    %30 = vector.shape_cast %29 : vector<1x32x1xf32> to vector<32x1xf32>
    %31 = vector.broadcast %30 : vector<32x1xf32> to vector<32x256xf32>
    %32 = arith.addf %28, %31 : vector<32x256xf32>
    %cst_14 = arith.constant 0.000000e+00 : f32
    %33 = vector.broadcast %cst_14 : f32 to vector<32x256xf32>
    %34 = arith.maximumf %32, %33 : vector<32x256xf32>
    %c0_15 = arith.constant 0 : index
    %c0_16 = arith.constant 0 : index
    %c0_17 = arith.constant 0 : index
    %35 = vector.load %arg7[%c0_15, %c0_16, %c0_17] : memref<5x32x32xf32, #tpu.memory_space<vmem>>, vector<1x32x32xf32>
    %36 = vector.shape_cast %35 : vector<1x32x32xf32> to vector<32x32xf32>
    %cst_18 = arith.constant dense<0.000000e+00> : vector<32x256xf32>
    %37 = tpu.matmul %36, %34, %cst_18 {dimension_numbers = #tpu.dot_dimension_numbers<[1], [0], [0], [1], [0, 0, 1, 1], [], []>} : vector<32x32xf32>, vector<32x256xf32>, vector<32x256xf32> -> vector<32x256xf32>
    %c0_19 = arith.constant 0 : index
    %c0_20 = arith.constant 0 : index
    %c0_21 = arith.constant 0 : index
    %38 = vector.load %arg8[%c0_19, %c0_20, %c0_21] : memref<5x32x1xf32, #tpu.memory_space<vmem>>, vector<1x32x1xf32>
    %39 = vector.shape_cast %38 : vector<1x32x1xf32> to vector<32x1xf32>
    %40 = vector.broadcast %39 : vector<32x1xf32> to vector<32x256xf32>
    %41 = arith.addf %37, %40 : vector<32x256xf32>
    %42 = arith.addf %23, %41 : vector<32x256xf32>
    %cst_22 = arith.constant 0.000000e+00 : f32
    %43 = vector.broadcast %cst_22 : f32 to vector<32x256xf32>
    %44 = arith.maximumf %42, %43 : vector<32x256xf32>
    %c1 = arith.constant 1 : index
    %c0_23 = arith.constant 0 : index
    %c0_24 = arith.constant 0 : index
    %45 = vector.load %arg5[%c1, %c0_23, %c0_24] : memref<5x32x32xf32, #tpu.memory_space<vmem>>, vector<1x32x32xf32>
    %46 = vector.shape_cast %45 : vector<1x32x32xf32> to vector<32x32xf32>
    %cst_25 = arith.constant dense<0.000000e+00> : vector<32x256xf32>
    %47 = tpu.matmul %46, %44, %cst_25 {dimension_numbers = #tpu.dot_dimension_numbers<[1], [0], [0], [1], [0, 0, 1, 1], [], []>} : vector<32x32xf32>, vector<32x256xf32>, vector<32x256xf32> -> vector<32x256xf32>
    %c1_26 = arith.constant 1 : index
    %c0_27 = arith.constant 0 : index
    %c0_28 = arith.constant 0 : index
    %48 = vector.load %arg6[%c1_26, %c0_27, %c0_28] : memref<5x32x1xf32, #tpu.memory_space<vmem>>, vector<1x32x1xf32>
    %49 = vector.shape_cast %48 : vector<1x32x1xf32> to vector<32x1xf32>
    %50 = vector.broadcast %49 : vector<32x1xf32> to vector<32x256xf32>
    %51 = arith.addf %47, %50 : vector<32x256xf32>
    %cst_29 = arith.constant 0.000000e+00 : f32
    %52 = vector.broadcast %cst_29 : f32 to vector<32x256xf32>
    %53 = arith.maximumf %51, %52 : vector<32x256xf32>
    %c1_30 = arith.constant 1 : index
    %c0_31 = arith.constant 0 : index
    %c0_32 = arith.constant 0 : index
    %54 = vector.load %arg7[%c1_30, %c0_31, %c0_32] : memref<5x32x32xf32, #tpu.memory_space<vmem>>, vector<1x32x32xf32>
    %55 = vector.shape_cast %54 : vector<1x32x32xf32> to vector<32x32xf32>
    %cst_33 = arith.constant dense<0.000000e+00> : vector<32x256xf32>
    %56 = tpu.matmul %55, %53, %cst_33 {dimension_numbers = #tpu.dot_dimension_numbers<[1], [0], [0], [1], [0, 0, 1, 1], [], []>} : vector<32x32xf32>, vector<32x256xf32>, vector<32x256xf32> -> vector<32x256xf32>
    %c1_34 = arith.constant 1 : index
    %c0_35 = arith.constant 0 : index
    %c0_36 = arith.constant 0 : index
    %57 = vector.load %arg8[%c1_34, %c0_35, %c0_36] : memref<5x32x1xf32, #tpu.memory_space<vmem>>, vector<1x32x1xf32>
    %58 = vector.shape_cast %57 : vector<1x32x1xf32> to vector<32x1xf32>
    %59 = vector.broadcast %58 : vector<32x1xf32> to vector<32x256xf32>
    %60 = arith.addf %56, %59 : vector<32x256xf32>
    %61 = arith.addf %42, %60 : vector<32x256xf32>
    %cst_37 = arith.constant 0.000000e+00 : f32
    %62 = vector.broadcast %cst_37 : f32 to vector<32x256xf32>
    %63 = arith.maximumf %61, %62 : vector<32x256xf32>
    %c2 = arith.constant 2 : index
    %c0_38 = arith.constant 0 : index
    %c0_39 = arith.constant 0 : index
    %64 = vector.load %arg5[%c2, %c0_38, %c0_39] : memref<5x32x32xf32, #tpu.memory_space<vmem>>, vector<1x32x32xf32>
    %65 = vector.shape_cast %64 : vector<1x32x32xf32> to vector<32x32xf32>
    %cst_40 = arith.constant dense<0.000000e+00> : vector<32x256xf32>
    %66 = tpu.matmul %65, %63, %cst_40 {dimension_numbers = #tpu.dot_dimension_numbers<[1], [0], [0], [1], [0, 0, 1, 1], [], []>} : vector<32x32xf32>, vector<32x256xf32>, vector<32x256xf32> -> vector<32x256xf32>
    %c2_41 = arith.constant 2 : index
    %c0_42 = arith.constant 0 : index
    %c0_43 = arith.constant 0 : index
    %67 = vector.load %arg6[%c2_41, %c0_42, %c0_43] : memref<5x32x1xf32, #tpu.memory_space<vmem>>, vector<1x32x1xf32>
    %68 = vector.shape_cast %67 : vector<1x32x1xf32> to vector<32x1xf32>
    %69 = vector.broadcast %68 : vector<32x1xf32> to vector<32x256xf32>
    %70 = arith.addf %66, %69 : vector<32x256xf32>
    %cst_44 = arith.constant 0.000000e+00 : f32
    %71 = vector.broadcast %cst_44 : f32 to vector<32x256xf32>
    %72 = arith.maximumf %70, %71 : vector<32x256xf32>
    %c2_45 = arith.constant 2 : index
    %c0_46 = arith.constant 0 : index
    %c0_47 = arith.constant 0 : index
    %73 = vector.load %arg7[%c2_45, %c0_46, %c0_47] : memref<5x32x32xf32, #tpu.memory_space<vmem>>, vector<1x32x32xf32>
    %74 = vector.shape_cast %73 : vector<1x32x32xf32> to vector<32x32xf32>
    %cst_48 = arith.constant dense<0.000000e+00> : vector<32x256xf32>
    %75 = tpu.matmul %74, %72, %cst_48 {dimension_numbers = #tpu.dot_dimension_numbers<[1], [0], [0], [1], [0, 0, 1, 1], [], []>} : vector<32x32xf32>, vector<32x256xf32>, vector<32x256xf32> -> vector<32x256xf32>
    %c2_49 = arith.constant 2 : index
    %c0_50 = arith.constant 0 : index
    %c0_51 = arith.constant 0 : index
    %76 = vector.load %arg8[%c2_49, %c0_50, %c0_51] : memref<5x32x1xf32, #tpu.memory_space<vmem>>, vector<1x32x1xf32>
    %77 = vector.shape_cast %76 : vector<1x32x1xf32> to vector<32x1xf32>
    %78 = vector.broadcast %77 : vector<32x1xf32> to vector<32x256xf32>
    %79 = arith.addf %75, %78 : vector<32x256xf32>
    %80 = arith.addf %61, %79 : vector<32x256xf32>
    %cst_52 = arith.constant 0.000000e+00 : f32
    %81 = vector.broadcast %cst_52 : f32 to vector<32x256xf32>
    %82 = arith.maximumf %80, %81 : vector<32x256xf32>
    %c3 = arith.constant 3 : index
    %c0_53 = arith.constant 0 : index
    %c0_54 = arith.constant 0 : index
    %83 = vector.load %arg5[%c3, %c0_53, %c0_54] : memref<5x32x32xf32, #tpu.memory_space<vmem>>, vector<1x32x32xf32>
    %84 = vector.shape_cast %83 : vector<1x32x32xf32> to vector<32x32xf32>
    %cst_55 = arith.constant dense<0.000000e+00> : vector<32x256xf32>
    %85 = tpu.matmul %84, %82, %cst_55 {dimension_numbers = #tpu.dot_dimension_numbers<[1], [0], [0], [1], [0, 0, 1, 1], [], []>} : vector<32x32xf32>, vector<32x256xf32>, vector<32x256xf32> -> vector<32x256xf32>
    %c3_56 = arith.constant 3 : index
    %c0_57 = arith.constant 0 : index
    %c0_58 = arith.constant 0 : index
    %86 = vector.load %arg6[%c3_56, %c0_57, %c0_58] : memref<5x32x1xf32, #tpu.memory_space<vmem>>, vector<1x32x1xf32>
    %87 = vector.shape_cast %86 : vector<1x32x1xf32> to vector<32x1xf32>
    %88 = vector.broadcast %87 : vector<32x1xf32> to vector<32x256xf32>
    %89 = arith.addf %85, %88 : vector<32x256xf32>
    %cst_59 = arith.constant 0.000000e+00 : f32
    %90 = vector.broadcast %cst_59 : f32 to vector<32x256xf32>
    %91 = arith.maximumf %89, %90 : vector<32x256xf32>
    %c3_60 = arith.constant 3 : index
    %c0_61 = arith.constant 0 : index
    %c0_62 = arith.constant 0 : index
    %92 = vector.load %arg7[%c3_60, %c0_61, %c0_62] : memref<5x32x32xf32, #tpu.memory_space<vmem>>, vector<1x32x32xf32>
    %93 = vector.shape_cast %92 : vector<1x32x32xf32> to vector<32x32xf32>
    %cst_63 = arith.constant dense<0.000000e+00> : vector<32x256xf32>
    %94 = tpu.matmul %93, %91, %cst_63 {dimension_numbers = #tpu.dot_dimension_numbers<[1], [0], [0], [1], [0, 0, 1, 1], [], []>} : vector<32x32xf32>, vector<32x256xf32>, vector<32x256xf32> -> vector<32x256xf32>
    %c3_64 = arith.constant 3 : index
    %c0_65 = arith.constant 0 : index
    %c0_66 = arith.constant 0 : index
    %95 = vector.load %arg8[%c3_64, %c0_65, %c0_66] : memref<5x32x1xf32, #tpu.memory_space<vmem>>, vector<1x32x1xf32>
    %96 = vector.shape_cast %95 : vector<1x32x1xf32> to vector<32x1xf32>
    %97 = vector.broadcast %96 : vector<32x1xf32> to vector<32x256xf32>
    %98 = arith.addf %94, %97 : vector<32x256xf32>
    %99 = arith.addf %80, %98 : vector<32x256xf32>
    %cst_67 = arith.constant 0.000000e+00 : f32
    %100 = vector.broadcast %cst_67 : f32 to vector<32x256xf32>
    %101 = arith.maximumf %99, %100 : vector<32x256xf32>
    %c4 = arith.constant 4 : index
    %c0_68 = arith.constant 0 : index
    %c0_69 = arith.constant 0 : index
    %102 = vector.load %arg5[%c4, %c0_68, %c0_69] : memref<5x32x32xf32, #tpu.memory_space<vmem>>, vector<1x32x32xf32>
    %103 = vector.shape_cast %102 : vector<1x32x32xf32> to vector<32x32xf32>
    %cst_70 = arith.constant dense<0.000000e+00> : vector<32x256xf32>
    %104 = tpu.matmul %103, %101, %cst_70 {dimension_numbers = #tpu.dot_dimension_numbers<[1], [0], [0], [1], [0, 0, 1, 1], [], []>} : vector<32x32xf32>, vector<32x256xf32>, vector<32x256xf32> -> vector<32x256xf32>
    %c4_71 = arith.constant 4 : index
    %c0_72 = arith.constant 0 : index
    %c0_73 = arith.constant 0 : index
    %105 = vector.load %arg6[%c4_71, %c0_72, %c0_73] : memref<5x32x1xf32, #tpu.memory_space<vmem>>, vector<1x32x1xf32>
    %106 = vector.shape_cast %105 : vector<1x32x1xf32> to vector<32x1xf32>
    %107 = vector.broadcast %106 : vector<32x1xf32> to vector<32x256xf32>
    %108 = arith.addf %104, %107 : vector<32x256xf32>
    %cst_74 = arith.constant 0.000000e+00 : f32
    %109 = vector.broadcast %cst_74 : f32 to vector<32x256xf32>
    %110 = arith.maximumf %108, %109 : vector<32x256xf32>
    %c4_75 = arith.constant 4 : index
    %c0_76 = arith.constant 0 : index
    %c0_77 = arith.constant 0 : index
    %111 = vector.load %arg7[%c4_75, %c0_76, %c0_77] : memref<5x32x32xf32, #tpu.memory_space<vmem>>, vector<1x32x32xf32>
    %112 = vector.shape_cast %111 : vector<1x32x32xf32> to vector<32x32xf32>
    %cst_78 = arith.constant dense<0.000000e+00> : vector<32x256xf32>
    %113 = tpu.matmul %112, %110, %cst_78 {dimension_numbers = #tpu.dot_dimension_numbers<[1], [0], [0], [1], [0, 0, 1, 1], [], []>} : vector<32x32xf32>, vector<32x256xf32>, vector<32x256xf32> -> vector<32x256xf32>
    %c4_79 = arith.constant 4 : index
    %c0_80 = arith.constant 0 : index
    %c0_81 = arith.constant 0 : index
    %114 = vector.load %arg8[%c4_79, %c0_80, %c0_81] : memref<5x32x1xf32, #tpu.memory_space<vmem>>, vector<1x32x1xf32>
    %115 = vector.shape_cast %114 : vector<1x32x1xf32> to vector<32x1xf32>
    %116 = vector.broadcast %115 : vector<32x1xf32> to vector<32x256xf32>
    %117 = arith.addf %113, %116 : vector<32x256xf32>
    %118 = arith.addf %99, %117 : vector<32x256xf32>
    %c0_82 = arith.constant 0 : index
    %c0_83 = arith.constant 0 : index
    %119 = vector.load %arg9[%c0_82, %c0_83] : memref<32x1xf32, #tpu.memory_space<vmem>>, vector<32x1xf32>
    %cst_84 = arith.constant 0.000000e+00 : f32
    %120 = vector.broadcast %cst_84 : f32 to vector<32x256xf32>
    %121 = arith.maximumf %118, %120 : vector<32x256xf32>
    %122 = vector.broadcast %119 : vector<32x1xf32> to vector<32x256xf32>
    %123 = arith.mulf %122, %121 : vector<32x256xf32>
    %cst_85 = arith.constant dense<0.000000e+00> : vector<256xf32>
    %124 = vector.multi_reduction <add>, %123, %cst_85 [0] : vector<32x256xf32> to vector<256xf32>
    %125 = vector.shape_cast %124 : vector<256xf32> to vector<1x256xf32>
    %c0_86 = arith.constant 0 : index
    %c0_87 = arith.constant 0 : index
    %126 = vector.load %arg10[%c0_86, %c0_87] : memref<1x1xf32, #tpu.memory_space<vmem>>, vector<1x1xf32>
    %127 = vector.broadcast %126 : vector<1x1xf32> to vector<1x256xf32>
    %128 = arith.addf %125, %127 : vector<1x256xf32>
    %c0_88 = arith.constant 0 : index
    %c0_89 = arith.constant 0 : index
    %c0_90 = arith.constant 0 : index
    %129 = vector.load %arg11[%c0_88, %c0_89, %c0_90] : memref<1x1x256xf32, #tpu.memory_space<vmem>>, vector<1x1x256xf32>
    %130 = vector.shape_cast %129 : vector<1x1x256xf32> to vector<1x256xf32>
    %131 = vector.shape_cast %128 : vector<1x256xf32> to vector<1x1x256xf32>
    tpu.vector_store %arg11[%c0_88, %c0_89, %c0_90], %131 {strides = array<i32>} : memref<1x1x256xf32, #tpu.memory_space<vmem>>, vector<1x1x256xf32>,
    return
  }
  func.func @transform_0(%arg0: i32, %arg1: i32) -> (i32, i32, i32) {
    %c0_i32 = arith.constant 0 : i32
    %c0_i32_0 = arith.constant 0 : i32
    return %arg0, %c0_i32, %arg1 : i32, i32, i32
  }
  func.func @transform_1(%arg0: i32, %arg1: i32) -> (i32, i32, i32) {
    %c0_i32 = arith.constant 0 : i32
    %c0_i32_0 = arith.constant 0 : i32
    %c0_i32_1 = arith.constant 0 : i32
    return %arg0, %c0_i32, %c0_i32_0 : i32, i32, i32
  }
  func.func @transform_2(%arg0: i32, %arg1: i32) -> (i32, i32) {
    %c0_i32 = arith.constant 0 : i32
    %c0_i32_0 = arith.constant 0 : i32
    %c0_i32_1 = arith.constant 0 : i32
    return %c0_i32, %c0_i32_0 : i32, i32
  }
  func.func @transform_3(%arg0: i32, %arg1: i32) -> (i32, i32, i32) {
    %c0_i32 = arith.constant 0 : i32
    %c0_i32_0 = arith.constant 0 : i32
    %c0_i32_1 = arith.constant 0 : i32
    %c0_i32_2 = arith.constant 0 : i32
    return %c0_i32, %c0_i32_0, %c0_i32_1 : i32, i32, i32
  }
  func.func @transform_4(%arg0: i32, %arg1: i32) -> (i32, i32, i32) {
    %c0_i32 = arith.constant 0 : i32
    %c0_i32_0 = arith.constant 0 : i32
    %c0_i32_1 = arith.constant 0 : i32
    %c0_i32_2 = arith.constant 0 : i32
    return %c0_i32, %c0_i32_0, %c0_i32_1 : i32, i32, i32
  }
  func.func @transform_5(%arg0: i32, %arg1: i32) -> (i32, i32, i32) {
    %c0_i32 = arith.constant 0 : i32
    %c0_i32_0 = arith.constant 0 : i32
    %c0_i32_1 = arith.constant 0 : i32
    %c0_i32_2 = arith.constant 0 : i32
    return %c0_i32, %c0_i32_0, %c0_i32_1 : i32, i32, i32
  }
  func.func @transform_6(%arg0: i32, %arg1: i32) -> (i32, i32, i32) {
    %c0_i32 = arith.constant 0 : i32
    %c0_i32_0 = arith.constant 0 : i32
    %c0_i32_1 = arith.constant 0 : i32
    %c0_i32_2 = arith.constant 0 : i32
    return %c0_i32, %c0_i32_0, %c0_i32_1 : i32, i32, i32
  }
  func.func @transform_7(%arg0: i32, %arg1: i32) -> (i32, i32) {
    %c0_i32 = arith.constant 0 : i32
    %c0_i32_0 = arith.constant 0 : i32
    %c0_i32_1 = arith.constant 0 : i32
    return %c0_i32, %c0_i32_0 : i32, i32
  }
  func.func @transform_8(%arg0: i32, %arg1: i32) -> (i32, i32) {
    %c0_i32 = arith.constant 0 : i32
    %c0_i32_0 = arith.constant 0 : i32
    %c0_i32_1 = arith.constant 0 : i32
    return %c0_i32, %c0_i32_0 : i32, i32
  }
  func.func @transform_9(%arg0: i32, %arg1: i32) -> (i32, i32, i32) {
    %c0_i32 = arith.constant 0 : i32
    %c0_i32_0 = arith.constant 0 : i32
    return %arg0, %c0_i32, %arg1 : i32, i32, i32
  }
}

</mosaic_0001>

<bundles_post_ra>
// kernel: decoder_forward.1
= control target key start
LH: loop header
LB: loop body
LE: loop exit
PB: predicated region body
PF: predicated region fallthrough
CT: control target
= control target key end

     0   :  { %s2431_s11 = smov 0   ;;  %s2433_s12 = smov 0   ;;  %s3017_s0 = inlined_call_operand.vmem [shape: f32[2,3,256], index: 0, kind: input, shape index: {}]   ;;  %s3018_s1 = inlined_call_operand.vmem [shape: f32[2,32,1], index: 1, kind: input, shape index: {}]   ;;  %s3019_s2 = inlined_call_operand.vmem [shape: f32[32,3], index: 2, kind: input, shape index: {}]   ;;  %s3020_s3 = inlined_call_operand.vmem [shape: f32[5,32,32], index: 3, kind: input, shape index: {}]   ;;  %s3021_s4 = inlined_call_operand.vmem [shape: f32[5,32,1], index: 4, kind: input, shape index: {}]   ;;  %s3022_s5 = inlined_call_operand.vmem [shape: f32[5,32,32], index: 5, kind: input, shape index: {}]   ;;  %s3023_s6 = inlined_call_operand.vmem [shape: f32[5,32,1], index: 6, kind: input, shape index: {}]   ;;  %s3024_s7 = inlined_call_operand.vmem [shape: f32[32,1], index: 7, kind: input, shape index: {}]   ;;  %s3025_s8 = inlined_call_operand.<no memory space> [shape: f32[1,1], index: 8, kind: input, shape index: {}]   ;;  %s3026_s9 = inlined_call_operand.vmem [shape: f32[2,1,256], index: 9, kind: output, shape index: {}]  }
   0x1   :  { %v14_v0 = vstv %s3025_s8  ;;  %s2435_s13 = smov 0  }
   0x2   :  { %15 = vst [vmem:[#allocation2] sm:$0x1] %v14_v0 }
   0x3 LB: > { %s33_s8 = sadd.s32 1, %s2367_s12  ;;  %p2193_p0 = scmp.ge.s32.totalorder %s2371_s13, 1  ;;  %s2371_s13 = sphi %s2435_s13, %s21_s13   ;;  %s2367_s12 = sphi %s2433_s12, %s3028_s12   ;;  %s2363_s11 = sphi %s2431_s11, %s3027_s11  }
   0x4   : > { %p35_p1 = scmp.ge.s32.totalorder %s33_s8, 2  ;;  %p320_p2 = scmp.lt.s32.totalorder %s2371_s13, 3 }
   0x6   : > { %s3030_s8 = smov (%p35_p1, %s33_s8), 0  ;;  %p321_p3 = pnand %p2193_p0, %p320_p2 }
   0x7   : > { %p369_p4 = scmp.lt.s32.totalorder (!%p321_p3), %s2363_s11, 1 }
   0x8   : > { %324 = sbr.rel (%p321_p3) target bundleno = 2403 (0x963), region = 56 }
   0xd   : > { %v396_v1 = vld [vmem:[%s3019_s2 + $0x18] sm:$0xff]  ;;  %v395_v2 = vld [vmem:[%s3019_s2 + $0x10] sm:$0xff]  ;;  %v2373_v3 = vmov 1   ;;  %s3032_s11 = smov (!%p369_p4, %s2363_s11), 1  ;;  %v2374_v4 = vmov 0   ;;  %v394_v7 = vld [vmem:[%s3019_s2 + $0x8] sm:$0xff]  ;;  %v422_v49 = vlaneseq }
   0xe   : > { %2338 = vset.pattern.permute.xlu0 %v2373_v3  ;;  %2336 = vset.pattern.permute.xlu1 %v2373_v3  ;;  %s2306_s18 = sshll.u32 %s3032_s11, 5  ;;  %v2375_v8 = vmov 2   ;;  %v393_v10 = vld [vmem:[%s3019_s2] sm:$0xff]  ;;  %v591_v12 = vld [vmem:[%s3021_s4 + $0x18] sm:$0xff]  ;;  %v2376_v13 = vmov 0.0   ;;  %v590_v14 = vld [vmem:[%s3021_s4 + $0x10] sm:$0xff] }
   0xf   : > { %489 = vperm.xlu1 %2336, %v396_v1   ;;  %485 = vperm.xlu0 %2338, %v395_v2   ;;  %s382_s21 = scalar_lea.vmem %s3018_s1, %s2306_s18  ;;  %v589_v15 = vld [vmem:[%s3021_s4 + $0x8] sm:$0xff]  ;;  %v729_v16 = vld [vmem:[%s3023_s6 + $0x18] sm:$0xff]  ;;  %v588_v17 = vld [vmem:[%s3021_s4] sm:$0xff]  ;;  %s2305_s30 = sshll.u32 %s3032_s11, 3  ;;  %v2585_v52 = vshrl.u32 %v422_v49, 7  ;;  %vm612_vm0 = vcmask 261120  }
  0x10   : > { %v400_v5 = vld [vmem:[%s382_s21 + $0x18] sm:$0xff]  ;;  %v399_v6 = vld [vmem:[%s382_s21 + $0x10] sm:$0xff]  ;;  %v398_v9 = vld [vmem:[%s382_s21 + $0x8] sm:$0xff]  ;;  %689 = vmatprep.mubr.f32.mxu0 %v2376_v13  ;;  %826 = vmatprep.mubr.f32.mxu1 %v2376_v13  ;;  %s376_s19 = scalar_lea.vmem %s3017_s0, %s2305_s30  ;;  %s2198_s18 = sshll.u32 %s3032_s11, 1  ;;  %vm2093_vm1 = vcmp.lt.s32.totalorder %v422_v49, 256 }
  0x11   : > { %v397_v11 = vld [vmem:[%s382_s21] sm:$0xff]  ;;  %v727_v18 = vld [vmem:[%s3023_s6 + $0x8] sm:$0xff]  ;;  %v728_v19 = vld [vmem:[%s3023_s6 + $0x10] sm:$0xff]  ;;  %v2597_v55 = vsub.s32 0, %v2585_v52  ;;  %v428_v56 = vsub.s32 4, %v2585_v52  ;;  %v494_v0 = vsub.s32 1, %v2585_v52  ;;  %s390_s21 = scalar_lea.vmem %s3026_s9, %s2198_s18 }
  0x12   : > { %v2214_v20 = vld [vmem:[%s3021_s4 + $0x38] sm:$0xff]  ;;  %v726_v21 = vld [vmem:[%s3023_s6] sm:$0xff]  ;;  %v2212_v22 = vld [vmem:[%s3021_s4 + $0x28] sm:$0xff] }
  0x13   : > { %2337 = vset.pattern.permute.xlu1 %v2374_v4  ;;  %2339 = vset.pattern.permute.xlu0 %v2374_v4  ;;  %v2213_v23 = vld [vmem:[%s3021_s4 + $0x30] sm:$0xff]  ;;  %v2226_v24 = vld [vmem:[%s3023_s6 + $0x38] sm:$0xff]  ;;  %v2211_v25 = vld [vmem:[%s3021_s4 + $0x20] sm:$0xff] }
  0x14   : > { %418 = vperm.xlu0 %2339, %v396_v1   ;;  %465 = vperm.xlu1 %2337, %v400_v5   ;;  %v2224_v26 = vld [vmem:[%s3023_s6 + $0x28] sm:$0xff]  ;;  %v2225_v27 = vld [vmem:[%s3023_s6 + $0x30] sm:$0xff]  ;;  %v2238_v28 = vld [vmem:[%s3021_s4 + $0x58] sm:$0xff]  ;;  %v544_v5 = vsub.s32 2, %v2585_v52 }
  0x15   : > { %v2223_v29 = vld [vmem:[%s3023_s6 + $0x20] sm:$0xff]  ;;  %v2236_v30 = vld [vmem:[%s3021_s4 + $0x48] sm:$0xff]  ;;  %v2237_v31 = vld [vmem:[%s3021_s4 + $0x50] sm:$0xff] }
  0x16   : > { %v2250_v32 = vld [vmem:[%s3023_s6 + $0x58] sm:$0xff]  ;;  %v2235_v33 = vld [vmem:[%s3021_s4 + $0x40] sm:$0xff]  ;;  %v2248_v34 = vld [vmem:[%s3023_s6 + $0x48] sm:$0xff] }
  0x17   : > { %v2249_v35 = vld [vmem:[%s3023_s6 + $0x50] sm:$0xff]  ;;  %v2262_v36 = vld [vmem:[%s3021_s4 + $0x78] sm:$0xff]  ;;  %v2247_v37 = vld [vmem:[%s3023_s6 + $0x40] sm:$0xff] }
  0x18   : > { %413 = vperm.xlu0 %2339, %v395_v2   ;;  %460 = vperm.xlu1 %2337, %v399_v6   ;;  %v2260_v38 = vld [vmem:[%s3021_s4 + $0x68] sm:$0xff]  ;;  %v2261_v39 = vld [vmem:[%s3021_s4 + $0x70] sm:$0xff]  ;;  %v2274_v40 = vld [vmem:[%s3023_s6 + $0x78] sm:$0xff]  ;;  %v548_v6 = vsub.s32 6, %v2585_v52 }
  0x19   : > { %v2259_v41 = vld [vmem:[%s3021_s4 + $0x60] sm:$0xff]  ;;  %v2272_v42 = vld [vmem:[%s3023_s6 + $0x68] sm:$0xff]  ;;  %v2273_v43 = vld [vmem:[%s3023_s6 + $0x70] sm:$0xff] }
  0x1a   : > { %v2286_v44 = vld [vmem:[%s3021_s4 + $0x98] sm:$0xff]  ;;  %v2271_v45 = vld [vmem:[%s3023_s6 + $0x60] sm:$0xff]  ;;  %v2284_v46 = vld [vmem:[%s3021_s4 + $0x88] sm:$0xff] }
  0x1b   : > { %v2285_v47 = vld [vmem:[%s3021_s4 + $0x90] sm:$0xff]  ;;  %v2295_v48 = vld [vmem:[%s3023_s6 + $0x80] sm:$0xff]  ;;  %v2296_v53 = vld [vmem:[%s3023_s6 + $0x88] sm:$0xff] }
  0x1c   : > { %408 = vperm.xlu0 %2339, %v394_v7   ;;  %2340 = vset.pattern.permute.xlu1 %v2375_v8  ;;  %v2283_v50 = vld [vmem:[%s3021_s4 + $0x80] sm:$0xff]  ;;  %v2297_v51 = vld [vmem:[%s3023_s6 + $0x90] sm:$0xff]  ;;  %v2298_v58 = vld [vmem:[%s3023_s6 + $0x98] sm:$0xff] }
  0x1d   : > { %539 = vperm.xlu1 %2340, %v396_v1   ;;  %v2003_v54 = vld [vmem:[%s3024_s7] sm:$0xff]  ;;  %v2005_v61 = vld [vmem:[%s3024_s7 + $0x10] sm:$0xff]  ;;  %v498_v1 = vsub.s32 5, %v2585_v52 }
  0x1e   : > { %v392_v57 = vld [vmem:[%s376_s19] sm:$0x77] }
  0x1f   : > { %v425_v59 = vrot.slane %v392_v57, %v2597_v55  ;;  %v429_v60 = vrot.slane %v392_v57, %v428_v56 }
  0x20   : > { %455 = vperm.xlu0 %2339, %v398_v9   ;;  %v499_v9 = vrot.slane %v392_v57, %v498_v1 }
  0x21   : > { %2341 = vset.pattern.permute.xlu1 %v2374_v4 }
  0x22   : > { %403 = vperm.xlu1 %2341, %v393_v10  }
  0x24   : > { %450 = vperm.xlu0 %2339, %v397_v11  }
  0x26   : > { %2342 = vset.pattern.permute.xlu1 %v2373_v3 }
  0x27   : > { %481 = vperm.xlu1 %2342, %v394_v7  }
  0x28   : > { %2345 = vset.pattern.permute.xlu0 %v2375_v8 }
  0x29   : > { %531 = vperm.xlu0 %2345, %v394_v7   ;;  %v2061_v7 = vld [vmem:[#allocation2] sm:$0x1] }
  0x2b   : > { %2343 = vset.pattern.permute.xlu1 %v2375_v8 }
  0x2c   : > { %535 = vperm.xlu1 %2343, %v395_v2   ;;  %v2004_v2 = vld [vmem:[%s3024_s7 + $0x8] sm:$0xff] }
  0x2d   : > { %2348 = vset.pattern.permute.xlu0 %v2374_v4 }
  0x2e   : > { %604 = vperm.xlu0 %2348, %v590_v14  }
  0x30   : > { %2344 = vset.pattern.permute.xlu1 %v2373_v3  ;;  %v2613_v3 = vrot.slane %v425_v59, %v2597_v55 }
  0x31   : > { %477 = vperm.xlu1 %2344, %v393_v10  }
  0x32   : > { %747 = vperm.xlu0 %2348, %v729_v16   ;;  %v545_v16 = vrot.slane %v392_v57, %v544_v5 }
  0x35   : > { %2346 = vset.pattern.permute.xlu1 %v2375_v8  ;;  %v495_v8 = vrot.slane %v392_v57, %v494_v0 }
  0x36   : > { %527 = vperm.xlu1 %2346, %v393_v10   ;;  %737 = vperm.xlu0 %2348, %v727_v18  }
  0x37   : > { %v505_v18 = vrot.slane %v495_v8, %v494_v0 }
  0x3a   : > { %2347 = vset.pattern.permute.xlu1 %v2374_v4  ;;  %894 = vperm.xlu0 %2348, %v2214_v20   ;;  %v2616_v4 = vrot.slane %v429_v60, %v2597_v55 }
  0x3b   : > { %609 = vperm.xlu1 %2347, %v591_v12   ;;  %v2006_v12 = vld [vmem:[%s3024_s7 + $0x18] sm:$0xff] }
  0x3e   : > { %884 = vperm.xlu0 %2348, %v2212_v22  }
  0x3f   : > { %599 = vperm.xlu1 %2347, %v589_v15  }
  0x42   : > { %1033 = vperm.xlu0 %2348, %v2226_v24   ;;  %v2625_v24 = vrot.slane %v545_v16, %v544_v5 }
  0x43   : > { %594 = vperm.xlu1 %2347, %v588_v17   ;;  %v549_v17 = vrot.slane %v392_v57, %v548_v6 }
  0x46   : > { %1023 = vperm.xlu0 %2348, %v2224_v26  }
  0x47   : > { %742 = vperm.xlu1 %2347, %v728_v19   ;;  %v509_v19 = vrot.slane %v499_v9, %v494_v0 }
  0x4a   : > { %1180 = vperm.xlu0 %2348, %v2238_v28  }
  0x4b   : > { %732 = vperm.xlu1 %2347, %v726_v21  }
  0x4e   : > { %1170 = vperm.xlu0 %2348, %v2236_v30  }
  0x4f   : > { %889 = vperm.xlu1 %2347, %v2213_v23  }
  0x52   : > { %1319 = vperm.xlu0 %2348, %v2250_v32  }
  0x53   : > { %879 = vperm.xlu1 %2347, %v2211_v25   ;;  %v2627_v25 = vrot.slane %v549_v17, %v544_v5 }
  0x56   : > { %1309 = vperm.xlu0 %2348, %v2248_v34  }
  0x57   : > { %1028 = vperm.xlu1 %2347, %v2225_v27  }
  0x5a   : > { %1466 = vperm.xlu0 %2348, %v2262_v36  }
  0x5b   : > { %1018 = vperm.xlu1 %2347, %v2223_v29  }
  0x5e   : > { %1456 = vperm.xlu0 %2348, %v2260_v38  }
  0x5f   : > { %1175 = vperm.xlu1 %2347, %v2237_v31  }
  0x62   : > { %1605 = vperm.xlu0 %2348, %v2274_v40  }
  0x63   : > { %1165 = vperm.xlu1 %2347, %v2235_v33  }
  0x66   : > { %1595 = vperm.xlu0 %2348, %v2272_v42  }
  0x67   : > { %1314 = vperm.xlu1 %2347, %v2249_v35  }
  0x6a   : > { %1752 = vperm.xlu0 %2348, %v2286_v44  }
  0x6b   : > { %1304 = vperm.xlu1 %2347, %v2247_v37  }
  0x6e   : > { %1742 = vperm.xlu0 %2348, %v2284_v46  }
  0x6f   : > { %1461 = vperm.xlu1 %2347, %v2261_v39  }
  0x72   : > { %1876 = vperm.xlu0 %2348, %v2295_v48  }
  0x73   : > { %1451 = vperm.xlu1 %2347, %v2259_v41  }
  0x76   : > { %1886 = vperm.xlu0 %2348, %v2297_v51  }
  0x77   : > { %1600 = vperm.xlu1 %2347, %v2273_v43  }
  0x7a   : > { %2017 = vperm.xlu0 %2348, %v2003_v54  }
  0x7b   : > { %1590 = vperm.xlu1 %2347, %v2271_v45  }
  0x7e   : > { %2027 = vperm.xlu0 %2348, %v2005_v61  }
  0x7f   : > { %1747 = vperm.xlu1 %2347, %v2285_v47  }
  0x82   : > { %2064 = vperm.xlu0 %2348, %v2061_v7  }
  0x83   : > { %1737 = vperm.xlu1 %2347, %v2283_v50  }
  0x87   : > { %1881 = vperm.xlu1 %2347, %v2296_v53  }
  0x8a   : > { %v490_v62 = vpop.permute.xlu1 %489  ;;  %v486_v63 = vpop.permute.xlu0 %485 }
  0x8b   : > { %1891 = vperm.xlu1 %2347, %v2298_v58   ;;  %v516_v26 = vmul.f32 %v505_v18, %v490_v62  ;;  %v517_v27 = vmul.f32 %v509_v19, %v490_v62  ;;  %v514_v46 = vmul.f32 %v505_v18, %v486_v63  ;;  %v515_v50 = vmul.f32 %v509_v19, %v486_v63 }
  0x8f   : > { %v419_v10 = vpop.permute.xlu0 %418  ;;  %v466_v11 = vpop.permute.xlu1 %465  ;;  %2022 = vperm.xlu1 %2347, %v2004_v2  }
  0x90   : > { %v446_v14 = vmul.f32 %v2613_v3, %v419_v10  ;;  %v447_v15 = vmul.f32 %v2616_v4, %v419_v10 }
  0x92   : > { %v474_v22 = vadd.f32 %v466_v11, %v446_v14  ;;  %v475_v23 = vadd.f32 %v466_v11, %v447_v15 }
  0x93   : > { %v414_v20 = vpop.permute.xlu0 %413  ;;  %v461_v21 = vpop.permute.xlu1 %460  ;;  %2032 = vperm.xlu1 %2347, %v2006_v12  }
  0x94   : > { %v524_v30 = vadd.f32 %v516_v26, %v474_v22  ;;  %v525_v31 = vadd.f32 %v517_v27, %v475_v23  ;;  %v444_v41 = vmul.f32 %v2613_v3, %v414_v20  ;;  %v445_v42 = vmul.f32 %v2616_v4, %v414_v20 }
  0x96   : > { %v472_v51 = vadd.f32 %v461_v21, %v444_v41  ;;  %v473_v53 = vadd.f32 %v461_v21, %v445_v42 }
  0x97   : > { %v409_v28 = vpop.permute.xlu0 %408 }
  0x98   : > { %v540_v29 = vpop.permute.xlu1 %539  ;;  %v443_v43 = vmul.f32 %v2616_v4, %v409_v28  ;;  %v442_v44 = vmul.f32 %v2613_v3, %v409_v28  ;;  %v522_v0 = vadd.f32 %v514_v46, %v472_v51  ;;  %v523_v1 = vadd.f32 %v515_v50, %v473_v53 }
  0x99   : > { %v566_v32 = vmul.f32 %v2625_v24, %v540_v29  ;;  %v567_v33 = vmul.f32 %v2627_v25, %v540_v29 }
  0x9b   : > { %v456_v34 = vpop.permute.xlu0 %455  ;;  %v2631_v35 = vadd.f32 %v567_v33, %v525_v31  ;;  %v2633_v36 = vadd.f32 %v566_v32, %v524_v30  ;;  %v584_v30 = vld [vmem:[%s3020_s3] sm:$0xff]  ;;  %v587_v31 = vld [vmem:[%s3020_s3 + $0x18] sm:$0xff] }
  0x9c   : > { %v471_v54 = vadd.f32 %v456_v34, %v443_v43  ;;  %v470_v57 = vadd.f32 %v456_v34, %v442_v44 }
  0x9d   : > { %v404_v37 = vpop.permute.xlu1 %403  ;;  %v583_v38 = vmax.f32 %v2631_v35, 0.0  ;;  %v582_v39 = vmax.f32 %v2633_v36, 0.0 }
  0x9e   : > { %v440_v9 = vmul.f32 %v2613_v3, %v404_v37  ;;  %v441_v10 = vmul.f32 %v2616_v4, %v404_v37 }
  0x9f   : > { %v451_v40 = vpop.permute.xlu0 %450  ;;  %649 = vmatprep.subr.mxu0 %v583_v38 }
  0xa0   : > { %650 = vmatpush1.msra.mxu0 %v582_v39  ;;  %v468_v21 = vadd.f32 %v451_v40, %v440_v9  ;;  %v469_v22 = vadd.f32 %v451_v40, %v441_v10  ;;  %v724_v9 = vld [vmem:[%s3022_s5 + $0x10] sm:$0xff]  ;;  %v725_v10 = vld [vmem:[%s3022_s5 + $0x18] sm:$0xff] }
  0xa2   : > { %v482_v45 = vpop.permute.xlu1 %481 }
  0xa3   : > { %v512_v47 = vmul.f32 %v505_v18, %v482_v45  ;;  %v513_v48 = vmul.f32 %v509_v19, %v482_v45 }
  0xa4   : > { %v532_v56 = vpop.permute.xlu0 %531 }
  0xa5   : > { %v521_v58 = vadd.f32 %v513_v48, %v471_v54  ;;  %v563_v59 = vmul.f32 %v2627_v25, %v532_v56  ;;  %v520_v60 = vadd.f32 %v512_v47, %v470_v57  ;;  %v562_v61 = vmul.f32 %v2625_v24, %v532_v56 }
  0xa7   : > { %v536_v62 = vpop.permute.xlu1 %535  ;;  %v2645_v6 = vadd.f32 %v563_v59, %v521_v58  ;;  %v2651_v8 = vadd.f32 %v562_v61, %v520_v60 }
  0xa8   : > { %v564_v2 = vmul.f32 %v2625_v24, %v536_v62  ;;  %v565_v5 = vmul.f32 %v2627_v25, %v536_v62 }
  0xa9   : > { %v579_v17 = vmax.f32 %v2645_v6, 0.0  ;;  %v578_v20 = vmax.f32 %v2651_v8, 0.0  ;;  %v605_v43 = vpop.permute.xlu0 %604 }
  0xaa   : > { %v2647_v63 = vadd.f32 %v564_v2, %v522_v0  ;;  %v2649_v7 = vadd.f32 %v565_v5, %v523_v1  ;;  %v722_v2 = vld [vmem:[%s3022_s5] sm:$0xff]  ;;  %v723_v5 = vld [vmem:[%s3022_s5 + $0x8] sm:$0xff] }
  0xac   : > { %v478_v11 = vpop.permute.xlu1 %477  ;;  %v581_v12 = vmax.f32 %v2649_v7, 0.0  ;;  %v580_v14 = vmax.f32 %v2647_v63, 0.0 }
  0xad   : > { %v510_v15 = vmul.f32 %v505_v18, %v478_v11  ;;  %v511_v16 = vmul.f32 %v509_v19, %v478_v11 }
  0xae   : > { %651 = vmatprep.subr.mxu0 %v581_v12 }
  0xaf   : > { %652 = vmatpush1.msra.mxu0 %v580_v14  ;;  %v518_v3 = vadd.f32 %v510_v15, %v468_v21  ;;  %v519_v4 = vadd.f32 %v511_v16, %v469_v22  ;;  %v748_v16 = vpop.permute.xlu0 %747 }
  0xb0   : > { %653 = vmatprep.subr.mxu0 %v579_v17 }
  0xb1   : > { %v528_v23 = vpop.permute.xlu1 %527  ;;  %654 = vmatpush1.msra.mxu0 %v578_v20 }
  0xb2   : > { %v560_v26 = vmul.f32 %v2625_v24, %v528_v23  ;;  %v561_v27 = vmul.f32 %v2627_v25, %v528_v23  ;;  %v585_v24 = vld [vmem:[%s3020_s3 + $0x8] sm:$0xff]  ;;  %v586_v25 = vld [vmem:[%s3020_s3 + $0x10] sm:$0xff] }
  0xb4   : > { %v2661_v28 = vadd.f32 %v560_v26, %v518_v3  ;;  %v2663_v18 = vadd.f32 %v561_v27, %v519_v4  ;;  %v738_v4 = vpop.permute.xlu0 %737 }
  0xb6   : > { %v577_v19 = vmax.f32 %v2663_v18, 0.0  ;;  %v576_v29 = vmax.f32 %v2661_v28, 0.0  ;;  %v610_v37 = vpop.permute.xlu1 %609 }
  0xb8   : > { %655 = vmatprep.subr.mxu0 %v577_v19 }
  0xb9   : > { %656 = vmatpush1.msra.mxu0 %v576_v29 }
  0xba   : > { %2199 = vmatmul.mubr.msk.f32.vlgmr.msra.gmra.mxu0 %vm612_vm0, %v584_v30  ;;  %v600_v41 = vpop.permute.xlu1 %599 }
  0xbb   : > { %695 = vmatprep.mubr.f32.mxu0 %v2376_v13 }
  0xbe   : > { %2200 = vmatmul.mubr.msk.f32.gmra.mxu0 %vm612_vm0, %v585_v24  ;;  %v595_v53 = vpop.permute.xlu1 %594 }
  0xbf   : > { %701 = vmatprep.mubr.f32.mxu0 %v2376_v13 }
  0xc2   : > { %2201 = vmatmul.mubr.msk.f32.gmra.mxu0 %vm612_vm0, %v586_v25  ;;  %v743_v20 = vpop.permute.xlu1 %742 }
  0xc3   : > { %707 = vmatprep.mubr.f32.mxu0 %v2376_v13 }
  0xc6   : > { %2202 = vmatmul.mubr.msk.f32.gmra.mxu0 %vm612_vm0, %v587_v31  ;;  %v733_v30 = vpop.permute.xlu1 %732 }
  0xc7   : > { %973 = vmatprep.mubr.f32.mxu0 %v2376_v13 }
 0x17a   : > { %v691_v32 = vpop.f32.mrf.mxu0 }
 0x17b   : > { %v692_v59 = vadd.f32 %v691_v32, %v595_v53 }
 0x17c   : > { %v693_v33 = vpop.f32.mrf.mxu0 }
 0x17d   : > { %v694_v57 = vadd.f32 %v693_v33, %v595_v53  ;;  %v714_v1 = vmax.f32 %v692_v59, 0.0  ;;  %v895_v53 = vpop.permute.xlu0 %894 }
 0x17e   : > { %v697_v34 = vpop.f32.mrf.mxu0 }
 0x17f   : > { %v698_v54 = vadd.f32 %v697_v34, %v600_v41  ;;  %v715_v0 = vmax.f32 %v694_v57, 0.0 }
 0x180   : > { %v699_v38 = vpop.f32.mrf.mxu0 }
 0x181   : > { %v700_v50 = vadd.f32 %v699_v38, %v600_v41  ;;  %v716_v62 = vmax.f32 %v698_v54, 0.0 }
 0x182   : > { %v703_v39 = vpop.f32.mrf.mxu0 }
 0x183   : > { %v704_v48 = vadd.f32 %v703_v39, %v605_v43  ;;  %v717_v61 = vmax.f32 %v700_v50, 0.0 }
 0x184   : > { %v705_v40 = vpop.f32.mrf.mxu0 }
 0x185   : > { %v706_v46 = vadd.f32 %v705_v40, %v605_v43  ;;  %v718_v60 = vmax.f32 %v704_v48, 0.0  ;;  %v2208_v43 = vld [vmem:[%s3020_s3 + $0x28] sm:$0xff] }
 0x186   : > { %v709_v42 = vpop.f32.mrf.mxu0 }
 0x187   : > { %v710_v44 = vadd.f32 %v709_v42, %v610_v37  ;;  %v719_v58 = vmax.f32 %v706_v46, 0.0 }
 0x188   : > { %v711_v45 = vpop.f32.mrf.mxu0 }
 0x189   : > { %v712_v47 = vadd.f32 %v711_v45, %v610_v37  ;;  %v720_v56 = vmax.f32 %v710_v44, 0.0  ;;  %v2209_v44 = vld [vmem:[%s3020_s3 + $0x30] sm:$0xff]  ;;  %v2210_v45 = vld [vmem:[%s3020_s3 + $0x38] sm:$0xff] }
 0x18b   : > { %v721_v51 = vmax.f32 %v712_v47, 0.0 }
 0x18d   : > { %786 = vmatprep.subr.mxu1 %v721_v51 }
 0x18e   : > { %787 = vmatpush1.msra.mxu1 %v720_v56  ;;  %v890_v56 = vpop.permute.xlu1 %889 }
 0x18f   : > { %788 = vmatprep.subr.mxu1 %v719_v58 }
 0x190   : > { %789 = vmatpush1.msra.mxu1 %v718_v60 }
 0x191   : > { %790 = vmatprep.subr.mxu1 %v717_v61 }
 0x192   : > { %791 = vmatpush1.msra.mxu1 %v716_v62  ;;  %v885_v62 = vpop.permute.xlu0 %884 }
 0x193   : > { %792 = vmatprep.subr.mxu1 %v715_v0 }
 0x194   : > { %793 = vmatpush1.msra.mxu1 %v714_v1 }
 0x195   : > { %2203 = vmatmul.mubr.msk.f32.vlgmr.msra.gmra.mxu1 %vm612_vm0, %v722_v2 }
 0x196   : > { %832 = vmatprep.mubr.f32.mxu1 %v2376_v13 }
 0x199   : > { %2204 = vmatmul.mubr.msk.f32.gmra.mxu1 %vm612_vm0, %v723_v5  ;;  %v880_v5 = vpop.permute.xlu1 %879 }
 0x19a   : > { %838 = vmatprep.mubr.f32.mxu1 %v2376_v13 }
 0x19d   : > { %2205 = vmatmul.mubr.msk.f32.gmra.mxu1 %vm612_vm0, %v724_v9 }
 0x19e   : > { %844 = vmatprep.mubr.f32.mxu1 %v2376_v13 }
 0x1a1   : > { %2206 = vmatmul.mubr.msk.f32.gmra.mxu1 %vm612_vm0, %v725_v10 }
 0x1a2   : > { %1112 = vmatprep.mubr.f32.mxu1 %v2376_v13 }
 0x255   : > { %v828_v11 = vpop.f32.mrf.mxu1 }
 0x256   : > { %v829_v34 = vadd.f32 %v828_v11, %v733_v30 }
 0x257   : > { %v830_v12 = vpop.f32.mrf.mxu1 }
 0x258   : > { %v831_v31 = vadd.f32 %v830_v12, %v733_v30  ;;  %v2732_v41 = vadd.f32 %v829_v34, %v2661_v28  ;;  %v2207_v28 = vld [vmem:[%s3020_s3 + $0x20] sm:$0xff]  ;;  %v1034_v30 = vpop.permute.xlu0 %1033 }
 0x259   : > { %v834_v14 = vpop.f32.mrf.mxu1 }
 0x25a   : > { %v835_v24 = vadd.f32 %v834_v14, %v738_v4 }
 0x25b   : > { %v836_v15 = vpop.f32.mrf.mxu1 }
 0x25c   : > { %v837_v19 = vadd.f32 %v836_v15, %v738_v4  ;;  %v2724_v40 = vadd.f32 %v835_v24, %v2651_v8  ;;  %v2222_v4 = vld [vmem:[%s3022_s5 + $0x38] sm:$0xff] }
 0x25d   : > { %v840_v17 = vpop.f32.mrf.mxu1 }
 0x25e   : > { %v841_v26 = vadd.f32 %v840_v17, %v743_v20  ;;  %v2720_v38 = vadd.f32 %v837_v19, %v2645_v6  ;;  %v861_v8 = vmax.f32 %v2724_v40, 0.0 }
 0x25f   : > { %v842_v21 = vpop.f32.mrf.mxu1 }
 0x260   : > { %v843_v23 = vadd.f32 %v842_v21, %v743_v20  ;;  %v2717_v37 = vadd.f32 %v841_v26, %v2647_v63  ;;  %v862_v6 = vmax.f32 %v2720_v38, 0.0 }
 0x261   : > { %v846_v22 = vpop.f32.mrf.mxu1 }
 0x262   : > { %v847_v3 = vadd.f32 %v846_v22, %v748_v16  ;;  %v2711_v32 = vadd.f32 %v843_v23, %v2649_v7  ;;  %v2728_v7 = vadd.f32 %v831_v31, %v2663_v18  ;;  %v863_v63 = vmax.f32 %v2717_v37, 0.0  ;;  %v2219_v22 = vld [vmem:[%s3022_s5 + $0x20] sm:$0xff]  ;;  %v2220_v23 = vld [vmem:[%s3022_s5 + $0x28] sm:$0xff]  ;;  %v1029_v31 = vpop.permute.xlu1 %1028 }
 0x263   : > { %v848_v27 = vpop.f32.mrf.mxu1  ;;  %v859_v18 = vmax.f32 %v2732_v41, 0.0 }
 0x264   : > { %v849_v29 = vadd.f32 %v848_v27, %v748_v16  ;;  %v2708_v25 = vadd.f32 %v847_v3, %v2633_v36  ;;  %v860_v42 = vmax.f32 %v2728_v7, 0.0  ;;  %v2221_v3 = vld [vmem:[%s3022_s5 + $0x30] sm:$0xff] }
 0x266   : > { %v2714_v33 = vadd.f32 %v849_v29, %v2631_v35  ;;  %v865_v36 = vmax.f32 %v2708_v25, 0.0  ;;  %v864_v35 = vmax.f32 %v2711_v32, 0.0 }
 0x268   : > { %v866_v39 = vmax.f32 %v2714_v33, 0.0 }
 0x26a   : > { %933 = vmatprep.subr.mxu0 %v866_v39 }
 0x26b   : > { %934 = vmatpush1.msra.mxu0 %v865_v36 }
 0x26c   : > { %935 = vmatprep.subr.mxu0 %v864_v35 }
 0x26d   : > { %936 = vmatpush1.msra.mxu0 %v863_v63  ;;  %v1024_v63 = vpop.permute.xlu0 %1023 }
 0x26e   : > { %937 = vmatprep.subr.mxu0 %v862_v6 }
 0x26f   : > { %938 = vmatpush1.msra.mxu0 %v861_v8 }
 0x270   : > { %939 = vmatprep.subr.mxu0 %v860_v42 }
 0x271   : > { %940 = vmatpush1.msra.mxu0 %v859_v18 }
 0x272   : > { %2215 = vmatmul.mubr.msk.f32.vlgmr.msra.gmra.mxu0 %vm612_vm0, %v2207_v28  ;;  %v1019_v28 = vpop.permute.xlu1 %1018 }
 0x273   : > { %979 = vmatprep.mubr.f32.mxu0 %v2376_v13 }
 0x276   : > { %2216 = vmatmul.mubr.msk.f32.gmra.mxu0 %vm612_vm0, %v2208_v43 }
 0x277   : > { %985 = vmatprep.mubr.f32.mxu0 %v2376_v13 }
 0x27a   : > { %2217 = vmatmul.mubr.msk.f32.gmra.mxu0 %vm612_vm0, %v2209_v44 }
 0x27b   : > { %991 = vmatprep.mubr.f32.mxu0 %v2376_v13 }
 0x27e   : > { %2218 = vmatmul.mubr.msk.f32.gmra.mxu0 %vm612_vm0, %v2210_v45 }
 0x27f   : > { %1259 = vmatprep.mubr.f32.mxu0 %v2376_v13 }
 0x332   : > { %v975_v46 = vpop.f32.mrf.mxu0 }
 0x333   : > { %v976_v14 = vadd.f32 %v975_v46, %v880_v5 }
 0x334   : > { %v977_v47 = vpop.f32.mrf.mxu0 }
 0x335   : > { %v978_v11 = vadd.f32 %v977_v47, %v880_v5  ;;  %v998_v21 = vmax.f32 %v976_v14, 0.0  ;;  %v1181_v5 = vpop.permute.xlu0 %1180 }
 0x336   : > { %v981_v48 = vpop.f32.mrf.mxu0 }
 0x337   : > { %v982_v9 = vadd.f32 %v981_v48, %v885_v62  ;;  %v999_v20 = vmax.f32 %v978_v11, 0.0 }
 0x338   : > { %v983_v50 = vpop.f32.mrf.mxu0 }
 0x339   : > { %v984_v1 = vadd.f32 %v983_v50, %v885_v62  ;;  %v1000_v17 = vmax.f32 %v982_v9, 0.0 }
 0x33a   : > { %v987_v51 = vpop.f32.mrf.mxu0 }
 0x33b   : > { %v988_v0 = vadd.f32 %v987_v51, %v890_v56  ;;  %v1001_v16 = vmax.f32 %v984_v1, 0.0 }
 0x33c   : > { %v989_v54 = vpop.f32.mrf.mxu0 }
 0x33d   : > { %v990_v60 = vadd.f32 %v989_v54, %v890_v56  ;;  %v1002_v15 = vmax.f32 %v988_v0, 0.0 }
 0x33e   : > { %v993_v57 = vpop.f32.mrf.mxu0 }
 0x33f   : > { %v994_v58 = vadd.f32 %v993_v57, %v895_v53  ;;  %v1003_v12 = vmax.f32 %v990_v60, 0.0  ;;  %v2234_v60 = vld [vmem:[%s3020_s3 + $0x58] sm:$0xff] }
 0x340   : > { %v995_v59 = vpop.f32.mrf.mxu0 }
 0x341   : > { %v996_v61 = vadd.f32 %v995_v59, %v895_v53  ;;  %v1004_v10 = vmax.f32 %v994_v58, 0.0  ;;  %v2232_v58 = vld [vmem:[%s3020_s3 + $0x48] sm:$0xff]  ;;  %v2233_v59 = vld [vmem:[%s3020_s3 + $0x50] sm:$0xff] }
 0x343   : > { %v1005_v2 = vmax.f32 %v996_v61, 0.0 }
 0x345   : > { %1072 = vmatprep.subr.mxu1 %v1005_v2 }
 0x346   : > { %1073 = vmatpush1.msra.mxu1 %v1004_v10  ;;  %v1176_v10 = vpop.permute.xlu1 %1175 }
 0x347   : > { %1074 = vmatprep.subr.mxu1 %v1003_v12 }
 0x348   : > { %1075 = vmatpush1.msra.mxu1 %v1002_v15 }
 0x349   : > { %1076 = vmatprep.subr.mxu1 %v1001_v16 }
 0x34a   : > { %1077 = vmatpush1.msra.mxu1 %v1000_v17  ;;  %v1171_v17 = vpop.permute.xlu0 %1170 }
 0x34b   : > { %1078 = vmatprep.subr.mxu1 %v999_v20 }
 0x34c   : > { %1079 = vmatpush1.msra.mxu1 %v998_v21 }
 0x34d   : > { %2227 = vmatmul.mubr.msk.f32.vlgmr.msra.gmra.mxu1 %vm612_vm0, %v2219_v22 }
 0x34e   : > { %1118 = vmatprep.mubr.f32.mxu1 %v2376_v13 }
 0x351   : > { %2228 = vmatmul.mubr.msk.f32.gmra.mxu1 %vm612_vm0, %v2220_v23  ;;  %v1166_v23 = vpop.permute.xlu1 %1165 }
 0x352   : > { %1124 = vmatprep.mubr.f32.mxu1 %v2376_v13 }
 0x355   : > { %2229 = vmatmul.mubr.msk.f32.gmra.mxu1 %vm612_vm0, %v2221_v3 }
 0x356   : > { %1130 = vmatprep.mubr.f32.mxu1 %v2376_v13 }
 0x359   : > { %2230 = vmatmul.mubr.msk.f32.gmra.mxu1 %vm612_vm0, %v2222_v4 }
 0x35a   : > { %1398 = vmatprep.mubr.f32.mxu1 %v2376_v13 }
 0x40d   : > { %v1114_v26 = vpop.f32.mrf.mxu1 }
 0x40e   : > { %v1115_v48 = vadd.f32 %v1114_v26, %v1019_v28 }
 0x40f   : > { %v1116_v27 = vpop.f32.mrf.mxu1 }
 0x410   : > { %v1117_v45 = vadd.f32 %v1116_v27, %v1019_v28  ;;  %v2804_v56 = vadd.f32 %v1115_v48, %v2732_v41  ;;  %v2231_v41 = vld [vmem:[%s3020_s3 + $0x40] sm:$0xff]  ;;  %v1320_v28 = vpop.permute.xlu0 %1319 }
 0x411   : > { %v1120_v19 = vpop.f32.mrf.mxu1 }
 0x412   : > { %v1121_v43 = vadd.f32 %v1120_v19, %v1024_v63 }
 0x413   : > { %v1122_v29 = vpop.f32.mrf.mxu1 }
 0x414   : > { %v1123_v42 = vadd.f32 %v1122_v29, %v1024_v63  ;;  %v2796_v54 = vadd.f32 %v1121_v43, %v2724_v40  ;;  %v2246_v63 = vld [vmem:[%s3022_s5 + $0x58] sm:$0xff] }
 0x415   : > { %v1126_v24 = vpop.f32.mrf.mxu1 }
 0x416   : > { %v1127_v6 = vadd.f32 %v1126_v24, %v1029_v31  ;;  %v2792_v51 = vadd.f32 %v1123_v42, %v2720_v38  ;;  %v1147_v40 = vmax.f32 %v2796_v54, 0.0 }
 0x417   : > { %v1128_v34 = vpop.f32.mrf.mxu1 }
 0x418   : > { %v1129_v36 = vadd.f32 %v1128_v34, %v1029_v31  ;;  %v2789_v50 = vadd.f32 %v1127_v6, %v2717_v37  ;;  %v1148_v38 = vmax.f32 %v2792_v51, 0.0 }
 0x419   : > { %v1132_v39 = vpop.f32.mrf.mxu1 }
 0x41a   : > { %v1133_v35 = vadd.f32 %v1132_v39, %v1034_v30  ;;  %v2783_v46 = vadd.f32 %v1129_v36, %v2711_v32  ;;  %v2800_v32 = vadd.f32 %v1117_v45, %v2728_v7  ;;  %v1149_v37 = vmax.f32 %v2789_v50, 0.0  ;;  %v2243_v39 = vld [vmem:[%s3022_s5 + $0x40] sm:$0xff]  ;;  %v2244_v36 = vld [vmem:[%s3022_s5 + $0x48] sm:$0xff]  ;;  %v1315_v45 = vpop.permute.xlu1 %1314 }
 0x41b   : > { %v1134_v8 = vpop.f32.mrf.mxu1  ;;  %v1145_v7 = vmax.f32 %v2804_v56, 0.0 }
 0x41c   : > { %v1135_v18 = vadd.f32 %v1134_v8, %v1034_v30  ;;  %v2780_v44 = vadd.f32 %v1133_v35, %v2708_v25  ;;  %v1146_v57 = vmax.f32 %v2800_v32, 0.0  ;;  %v2245_v35 = vld [vmem:[%s3022_s5 + $0x50] sm:$0xff] }
 0x41e   : > { %v2786_v47 = vadd.f32 %v1135_v18, %v2714_v33  ;;  %v1151_v25 = vmax.f32 %v2780_v44, 0.0  ;;  %v1150_v33 = vmax.f32 %v2783_v46, 0.0 }
 0x420   : > { %v1152_v53 = vmax.f32 %v2786_v47, 0.0 }
 0x422   : > { %1219 = vmatprep.subr.mxu0 %v1152_v53 }
 0x423   : > { %1220 = vmatpush1.msra.mxu0 %v1151_v25 }
 0x424   : > { %1221 = vmatprep.subr.mxu0 %v1150_v33 }
 0x425   : > { %1222 = vmatpush1.msra.mxu0 %v1149_v37  ;;  %v1310_v37 = vpop.permute.xlu0 %1309 }
 0x426   : > { %1223 = vmatprep.subr.mxu0 %v1148_v38 }
 0x427   : > { %1224 = vmatpush1.msra.mxu0 %v1147_v40 }
 0x428   : > { %1225 = vmatprep.subr.mxu0 %v1146_v57 }
 0x429   : > { %1226 = vmatpush1.msra.mxu0 %v1145_v7 }
 0x42a   : > { %2239 = vmatmul.mubr.msk.f32.vlgmr.msra.gmra.mxu0 %vm612_vm0, %v2231_v41  ;;  %v1305_v41 = vpop.permute.xlu1 %1304 }
 0x42b   : > { %1265 = vmatprep.mubr.f32.mxu0 %v2376_v13 }
 0x42e   : > { %2240 = vmatmul.mubr.msk.f32.gmra.mxu0 %vm612_vm0, %v2232_v58 }
 0x42f   : > { %1271 = vmatprep.mubr.f32.mxu0 %v2376_v13 }
 0x432   : > { %2241 = vmatmul.mubr.msk.f32.gmra.mxu0 %vm612_vm0, %v2233_v59 }
 0x433   : > { %1277 = vmatprep.mubr.f32.mxu0 %v2376_v13 }
 0x436   : > { %2242 = vmatmul.mubr.msk.f32.gmra.mxu0 %vm612_vm0, %v2234_v60 }
 0x437   : > { %1545 = vmatprep.mubr.f32.mxu0 %v2376_v13 }
 0x4ea   : > { %v1261_v61 = vpop.f32.mrf.mxu0 }
 0x4eb   : > { %v1262_v19 = vadd.f32 %v1261_v61, %v1166_v23 }
 0x4ec   : > { %v1263_v62 = vpop.f32.mrf.mxu0 }
 0x4ed   : > { %v1264_v26 = vadd.f32 %v1263_v62, %v1166_v23  ;;  %v1284_v34 = vmax.f32 %v1262_v19, 0.0  ;;  %v1467_v23 = vpop.permute.xlu0 %1466 }
 0x4ee   : > { %v1267_v0 = vpop.f32.mrf.mxu0 }
 0x4ef   : > { %v1268_v3 = vadd.f32 %v1267_v0, %v1171_v17  ;;  %v1285_v31 = vmax.f32 %v1264_v26, 0.0 }
 0x4f0   : > { %v1269_v1 = vpop.f32.mrf.mxu0 }
 0x4f1   : > { %v1270_v21 = vadd.f32 %v1269_v1, %v1171_v17  ;;  %v1286_v24 = vmax.f32 %v1268_v3, 0.0 }
 0x4f2   : > { %v1273_v2 = vpop.f32.mrf.mxu0 }
 0x4f3   : > { %v1274_v20 = vadd.f32 %v1273_v2, %v1176_v10  ;;  %v1287_v30 = vmax.f32 %v1270_v21, 0.0 }
 0x4f4   : > { %v1275_v9 = vpop.f32.mrf.mxu0 }
 0x4f5   : > { %v1276_v15 = vadd.f32 %v1275_v9, %v1176_v10  ;;  %v1288_v29 = vmax.f32 %v1274_v20, 0.0 }
 0x4f6   : > { %v1279_v11 = vpop.f32.mrf.mxu0 }
 0x4f7   : > { %v1280_v12 = vadd.f32 %v1279_v11, %v1181_v5  ;;  %v1289_v27 = vmax.f32 %v1276_v15, 0.0  ;;  %v2258_v15 = vld [vmem:[%s3020_s3 + $0x78] sm:$0xff] }
 0x4f8   : > { %v1281_v14 = vpop.f32.mrf.mxu0 }
 0x4f9   : > { %v1282_v16 = vadd.f32 %v1281_v14, %v1181_v5  ;;  %v1290_v4 = vmax.f32 %v1280_v12, 0.0  ;;  %v2256_v12 = vld [vmem:[%s3020_s3 + $0x68] sm:$0xff]  ;;  %v2257_v14 = vld [vmem:[%s3020_s3 + $0x70] sm:$0xff] }
 0x4fb   : > { %v1291_v22 = vmax.f32 %v1282_v16, 0.0 }
 0x4fd   : > { %1358 = vmatprep.subr.mxu1 %v1291_v22 }
 0x4fe   : > { %1359 = vmatpush1.msra.mxu1 %v1290_v4  ;;  %v1462_v4 = vpop.permute.xlu1 %1461 }
 0x4ff   : > { %1360 = vmatprep.subr.mxu1 %v1289_v27 }
 0x500   : > { %1361 = vmatpush1.msra.mxu1 %v1288_v29 }
 0x501   : > { %1362 = vmatprep.subr.mxu1 %v1287_v30 }
 0x502   : > { %1363 = vmatpush1.msra.mxu1 %v1286_v24  ;;  %v1457_v24 = vpop.permute.xlu0 %1456 }
 0x503   : > { %1364 = vmatprep.subr.mxu1 %v1285_v31 }
 0x504   : > { %1365 = vmatpush1.msra.mxu1 %v1284_v34 }
 0x505   : > { %2251 = vmatmul.mubr.msk.f32.vlgmr.msra.gmra.mxu1 %vm612_vm0, %v2243_v39 }
 0x506   : > { %1404 = vmatprep.mubr.f32.mxu1 %v2376_v13 }
 0x509   : > { %2252 = vmatmul.mubr.msk.f32.gmra.mxu1 %vm612_vm0, %v2244_v36  ;;  %v1452_v36 = vpop.permute.xlu1 %1451 }
 0x50a   : > { %1410 = vmatprep.mubr.f32.mxu1 %v2376_v13 }
 0x50d   : > { %2253 = vmatmul.mubr.msk.f32.gmra.mxu1 %vm612_vm0, %v2245_v35 }
 0x50e   : > { %1416 = vmatprep.mubr.f32.mxu1 %v2376_v13 }
 0x511   : > { %2254 = vmatmul.mubr.msk.f32.gmra.mxu1 %vm612_vm0, %v2246_v63 }
 0x512   : > { %1684 = vmatprep.mubr.f32.mxu1 %v2376_v13 }
 0x5c5   : > { %v1400_v6 = vpop.f32.mrf.mxu1 }
 0x5c6   : > { %v1401_v0 = vadd.f32 %v1400_v6, %v1305_v41 }
 0x5c7   : > { %v1402_v8 = vpop.f32.mrf.mxu1 }
 0x5c8   : > { %v1403_v60 = vadd.f32 %v1402_v8, %v1305_v41  ;;  %v2876_v10 = vadd.f32 %v1401_v0, %v2804_v56  ;;  %v2255_v56 = vld [vmem:[%s3020_s3 + $0x60] sm:$0xff]  ;;  %v1606_v41 = vpop.permute.xlu0 %1605 }
 0x5c9   : > { %v1406_v42 = vpop.f32.mrf.mxu1 }
 0x5ca   : > { %v1407_v58 = vadd.f32 %v1406_v42, %v1310_v37 }
 0x5cb   : > { %v1408_v18 = vpop.f32.mrf.mxu1 }
 0x5cc   : > { %v1409_v57 = vadd.f32 %v1408_v18, %v1310_v37  ;;  %v2868_v9 = vadd.f32 %v1407_v58, %v2796_v54  ;;  %v2270_v37 = vld [vmem:[%s3022_s5 + $0x78] sm:$0xff] }
 0x5cd   : > { %v1412_v43 = vpop.f32.mrf.mxu1 }
 0x5ce   : > { %v1413_v38 = vadd.f32 %v1412_v43, %v1315_v45  ;;  %v2864_v2 = vadd.f32 %v1409_v57, %v2792_v51  ;;  %v1433_v54 = vmax.f32 %v2868_v9, 0.0 }
 0x5cf   : > { %v1414_v48 = vpop.f32.mrf.mxu1 }
 0x5d0   : > { %v1415_v25 = vadd.f32 %v1414_v48, %v1315_v45  ;;  %v2861_v1 = vadd.f32 %v1413_v38, %v2789_v50  ;;  %v1434_v51 = vmax.f32 %v2864_v2, 0.0 }
 0x5d1   : > { %v1418_v53 = vpop.f32.mrf.mxu1 }
 0x5d2   : > { %v1419_v33 = vadd.f32 %v1418_v53, %v1320_v28  ;;  %v2855_v61 = vadd.f32 %v1415_v25, %v2783_v46  ;;  %v2872_v46 = vadd.f32 %v1403_v60, %v2800_v32  ;;  %v1435_v50 = vmax.f32 %v2861_v1, 0.0  ;;  %v2267_v53 = vld [vmem:[%s3022_s5 + $0x60] sm:$0xff]  ;;  %v2268_v25 = vld [vmem:[%s3022_s5 + $0x68] sm:$0xff]  ;;  %v1601_v60 = vpop.permute.xlu1 %1600 }
 0x5d3   : > { %v1420_v40 = vpop.f32.mrf.mxu1  ;;  %v1431_v32 = vmax.f32 %v2876_v10, 0.0 }
 0x5d4   : > { %v1421_v7 = vadd.f32 %v1420_v40, %v1320_v28  ;;  %v2852_v59 = vadd.f32 %v1419_v33, %v2780_v44  ;;  %v1432_v11 = vmax.f32 %v2872_v46, 0.0  ;;  %v2269_v33 = vld [vmem:[%s3022_s5 + $0x70] sm:$0xff] }
 0x5d6   : > { %v2858_v62 = vadd.f32 %v1421_v7, %v2786_v47  ;;  %v1437_v44 = vmax.f32 %v2852_v59, 0.0  ;;  %v1436_v47 = vmax.f32 %v2855_v61, 0.0 }
 0x5d8   : > { %v1438_v5 = vmax.f32 %v2858_v62, 0.0 }
 0x5da   : > { %1505 = vmatprep.subr.mxu0 %v1438_v5 }
 0x5db   : > { %1506 = vmatpush1.msra.mxu0 %v1437_v44 }
 0x5dc   : > { %1507 = vmatprep.subr.mxu0 %v1436_v47 }
 0x5dd   : > { %1508 = vmatpush1.msra.mxu0 %v1435_v50  ;;  %v1596_v50 = vpop.permute.xlu0 %1595 }
 0x5de   : > { %1509 = vmatprep.subr.mxu0 %v1434_v51 }
 0x5df   : > { %1510 = vmatpush1.msra.mxu0 %v1433_v54 }
 0x5e0   : > { %1511 = vmatprep.subr.mxu0 %v1432_v11 }
 0x5e1   : > { %1512 = vmatpush1.msra.mxu0 %v1431_v32 }
 0x5e2   : > { %2263 = vmatmul.mubr.msk.f32.vlgmr.msra.gmra.mxu0 %vm612_vm0, %v2255_v56  ;;  %v1591_v56 = vpop.permute.xlu1 %1590 }
 0x5e3   : > { %1551 = vmatprep.mubr.f32.mxu0 %v2376_v13 }
 0x5e6   : > { %2264 = vmatmul.mubr.msk.f32.gmra.mxu0 %vm612_vm0, %v2256_v12 }
 0x5e7   : > { %1557 = vmatprep.mubr.f32.mxu0 %v2376_v13 }
 0x5ea   : > { %2265 = vmatmul.mubr.msk.f32.gmra.mxu0 %vm612_vm0, %v2257_v14 }
 0x5eb   : > { %1563 = vmatprep.mubr.f32.mxu0 %v2376_v13 }
 0x5ee   : > { %2266 = vmatmul.mubr.msk.f32.gmra.mxu0 %vm612_vm0, %v2258_v15 }
 0x5ef   : > { %1831 = vmatprep.mubr.f32.mxu0 %v2376_v13 }
 0x6a2   : > { %v1547_v16 = vpop.f32.mrf.mxu0 }
 0x6a3   : > { %v1548_v42 = vadd.f32 %v1547_v16, %v1452_v36 }
 0x6a4   : > { %v1549_v17 = vpop.f32.mrf.mxu0 }
 0x6a5   : > { %v1550_v6 = vadd.f32 %v1549_v17, %v1452_v36  ;;  %v1570_v48 = vmax.f32 %v1548_v42, 0.0  ;;  %v1753_v36 = vpop.permute.xlu0 %1752 }
 0x6a6   : > { %v1553_v20 = vpop.f32.mrf.mxu0 }
 0x6a7   : > { %v1554_v35 = vadd.f32 %v1553_v20, %v1457_v24  ;;  %v1571_v45 = vmax.f32 %v1550_v6, 0.0 }
 0x6a8   : > { %v1555_v21 = vpop.f32.mrf.mxu0 }
 0x6a9   : > { %v1556_v34 = vadd.f32 %v1555_v21, %v1457_v24  ;;  %v1572_v43 = vmax.f32 %v1554_v35, 0.0 }
 0x6aa   : > { %v1559_v22 = vpop.f32.mrf.mxu0 }
 0x6ab   : > { %v1560_v31 = vadd.f32 %v1559_v22, %v1462_v4  ;;  %v1573_v28 = vmax.f32 %v1556_v34, 0.0 }
 0x6ac   : > { %v1561_v3 = vpop.f32.mrf.mxu0 }
 0x6ad   : > { %v1562_v29 = vadd.f32 %v1561_v3, %v1462_v4  ;;  %v1574_v18 = vmax.f32 %v1560_v31, 0.0 }
 0x6ae   : > { %v1565_v26 = vpop.f32.mrf.mxu0 }
 0x6af   : > { %v1566_v27 = vadd.f32 %v1565_v26, %v1467_v23  ;;  %v1575_v8 = vmax.f32 %v1562_v29, 0.0  ;;  %v2282_v29 = vld [vmem:[%s3020_s3 + $0x98] sm:$0xff] }
 0x6b0   : > { %v1567_v19 = vpop.f32.mrf.mxu0 }
 0x6b1   : > { %v1568_v30 = vadd.f32 %v1567_v19, %v1467_v23  ;;  %v1576_v63 = vmax.f32 %v1566_v27, 0.0  ;;  %v2280_v27 = vld [vmem:[%s3020_s3 + $0x88] sm:$0xff]  ;;  %v2281_v19 = vld [vmem:[%s3020_s3 + $0x90] sm:$0xff] }
 0x6b3   : > { %v1577_v39 = vmax.f32 %v1568_v30, 0.0 }
 0x6b5   : > { %1644 = vmatprep.subr.mxu1 %v1577_v39 }
 0x6b6   : > { %1645 = vmatpush1.msra.mxu1 %v1576_v63  ;;  %v1748_v63 = vpop.permute.xlu1 %1747 }
 0x6b7   : > { %1646 = vmatprep.subr.mxu1 %v1575_v8 }
 0x6b8   : > { %1647 = vmatpush1.msra.mxu1 %v1574_v18 }
 0x6b9   : > { %1648 = vmatprep.subr.mxu1 %v1573_v28 }
 0x6ba   : > { %1649 = vmatpush1.msra.mxu1 %v1572_v43  ;;  %v1743_v43 = vpop.permute.xlu0 %1742 }
 0x6bb   : > { %1650 = vmatprep.subr.mxu1 %v1571_v45 }
 0x6bc   : > { %1651 = vmatpush1.msra.mxu1 %v1570_v48 }
 0x6bd   : > { %2275 = vmatmul.mubr.msk.f32.vlgmr.msra.gmra.mxu1 %vm612_vm0, %v2267_v53 }
 0x6be   : > { %1690 = vmatprep.mubr.f32.mxu1 %v2376_v13 }
 0x6c1   : > { %2276 = vmatmul.mubr.msk.f32.gmra.mxu1 %vm612_vm0, %v2268_v25  ;;  %v1738_v25 = vpop.permute.xlu1 %1737 }
 0x6c2   : > { %1696 = vmatprep.mubr.f32.mxu1 %v2376_v13 }
 0x6c5   : > { %2277 = vmatmul.mubr.msk.f32.gmra.mxu1 %vm612_vm0, %v2269_v33 }
 0x6c6   : > { %1702 = vmatprep.mubr.f32.mxu1 %v2376_v13 }
 0x6c9   : > { %2278 = vmatmul.mubr.msk.f32.gmra.mxu1 %vm612_vm0, %v2270_v37 }
 0x6ca   : > { %1970 = vmatprep.mubr.f32.mxu1 %v2376_v13 }
 0x77d   : > { %v1686_v38 = vpop.f32.mrf.mxu1 }
 0x77e   : > { %v1687_v20 = vadd.f32 %v1686_v38, %v1591_v56 }
 0x77f   : > { %v1688_v40 = vpop.f32.mrf.mxu1 }
 0x780   : > { %v1689_v15 = vadd.f32 %v1688_v40, %v1591_v56  ;;  %v2948_v4 = vadd.f32 %v1687_v20, %v2876_v10  ;;  %v2279_v10 = vld [vmem:[%s3020_s3 + $0x80] sm:$0xff] }
 0x781   : > { %v1692_v57 = vpop.f32.mrf.mxu1 }
 0x782   : > { %v1693_v12 = vadd.f32 %v1692_v57, %v1596_v50 }
 0x783   : > { %v1694_v7 = vpop.f32.mrf.mxu1 }
 0x784   : > { %v1695_v11 = vadd.f32 %v1694_v7, %v1596_v50  ;;  %v2940_v3 = vadd.f32 %v1693_v12, %v2868_v9  ;;  %v2294_v50 = vld [vmem:[%s3022_s5 + $0x98] sm:$0xff] }
 0x785   : > { %v1698_v58 = vpop.f32.mrf.mxu1 }
 0x786   : > { %v1699_v51 = vadd.f32 %v1698_v58, %v1601_v60  ;;  %v2936_v22 = vadd.f32 %v1695_v11, %v2864_v2  ;;  %v1719_v9 = vmax.f32 %v2940_v3, 0.0  ;;  %v1882_v11 = vpop.permute.xlu1 %1881 }
 0x787   : > { %v1700_v0 = vpop.f32.mrf.mxu1 }
 0x788   : > { %v1701_v44 = vadd.f32 %v1700_v0, %v1601_v60  ;;  %v2933_v21 = vadd.f32 %v1699_v51, %v2861_v1  ;;  %v1720_v2 = vmax.f32 %v2936_v22, 0.0  ;;  %v1877_v51 = vpop.permute.xlu0 %1876 }
 0x789   : > { %v1704_v5 = vpop.f32.mrf.mxu1 }
 0x78a   : > { %v1705_v47 = vadd.f32 %v1704_v5, %v1606_v41  ;;  %v2927_v16 = vadd.f32 %v1701_v44, %v2855_v61  ;;  %v2944_v61 = vadd.f32 %v1689_v15, %v2872_v46  ;;  %v1721_v1 = vmax.f32 %v2933_v21, 0.0  ;;  %v2291_v5 = vld [vmem:[%s3022_s5 + $0x80] sm:$0xff]  ;;  %v2292_v44 = vld [vmem:[%s3022_s5 + $0x88] sm:$0xff] }
 0x78b   : > { %v1706_v54 = vpop.f32.mrf.mxu1  ;;  %v1717_v46 = vmax.f32 %v2948_v4, 0.0 }
 0x78c   : > { %v1707_v32 = vadd.f32 %v1706_v54, %v1606_v41  ;;  %v2924_v14 = vadd.f32 %v1705_v47, %v2852_v59  ;;  %v1718_v26 = vmax.f32 %v2944_v61, 0.0  ;;  %v2293_v47 = vld [vmem:[%s3022_s5 + $0x90] sm:$0xff]  ;;  %v1887_v56 = vpop.permute.xlu0 %1886 }
 0x78e   : > { %v2930_v17 = vadd.f32 %v1707_v32, %v2858_v62  ;;  %v1723_v59 = vmax.f32 %v2924_v14, 0.0  ;;  %v1722_v62 = vmax.f32 %v2927_v16, 0.0 }
 0x790   : > { %v1724_v23 = vmax.f32 %v2930_v17, 0.0 }
 0x792   : > { %1791 = vmatprep.subr.mxu0 %v1724_v23 }
 0x793   : > { %1792 = vmatpush1.msra.mxu0 %v1723_v59 }
 0x794   : > { %1793 = vmatprep.subr.mxu0 %v1722_v62  ;;  %v1892_v62 = vpop.permute.xlu1 %1891 }
 0x795   : > { %1794 = vmatpush1.msra.mxu0 %v1721_v1 }
 0x796   : > { %1795 = vmatprep.subr.mxu0 %v1720_v2 }
 0x797   : > { %1796 = vmatpush1.msra.mxu0 %v1719_v9 }
 0x798   : > { %1797 = vmatprep.subr.mxu0 %v1718_v26  ;;  %v2018_v26 = vpop.permute.xlu0 %2017 }
 0x799   : > { %1798 = vmatpush1.msra.mxu0 %v1717_v46 }
 0x79a   : > { %2287 = vmatmul.mubr.msk.f32.vlgmr.msra.gmra.mxu0 %vm612_vm0, %v2279_v10 }
 0x79b   : > { %1837 = vmatprep.mubr.f32.mxu0 %v2376_v13 }
 0x79e   : > { %2288 = vmatmul.mubr.msk.f32.gmra.mxu0 %vm612_vm0, %v2280_v27 }
 0x79f   : > { %1843 = vmatprep.mubr.f32.mxu0 %v2376_v13 }
 0x7a2   : > { %2289 = vmatmul.mubr.msk.f32.gmra.mxu0 %vm612_vm0, %v2281_v19 }
 0x7a3   : > { %1849 = vmatprep.mubr.f32.mxu0 %v2376_v13 }
 0x7a6   : > { %2290 = vmatmul.mubr.msk.f32.gmra.mxu0 %vm612_vm0, %v2282_v29 }
 0x85a   : > { %v1833_v30 = vpop.f32.mrf.mxu0 }
 0x85b   : > { %v1834_v57 = vadd.f32 %v1833_v30, %v1738_v25 }
 0x85c   : > { %v1835_v24 = vpop.f32.mrf.mxu0 }
 0x85d   : > { %v1836_v38 = vadd.f32 %v1835_v24, %v1738_v25  ;;  %v1856_v0 = vmax.f32 %v1834_v57, 0.0 }
 0x85e   : > { %v1839_v31 = vpop.f32.mrf.mxu0 }
 0x85f   : > { %v1840_v33 = vadd.f32 %v1839_v31, %v1743_v43  ;;  %v1857_v60 = vmax.f32 %v1836_v38, 0.0 }
 0x860   : > { %v1841_v34 = vpop.f32.mrf.mxu0 }
 0x861   : > { %v1842_v48 = vadd.f32 %v1841_v34, %v1743_v43  ;;  %v1858_v58 = vmax.f32 %v1840_v33, 0.0 }
 0x862   : > { %v1845_v39 = vpop.f32.mrf.mxu0 }
 0x863   : > { %v1846_v45 = vadd.f32 %v1845_v39, %v1748_v63  ;;  %v1859_v41 = vmax.f32 %v1842_v48, 0.0 }
 0x864   : > { %v1847_v35 = vpop.f32.mrf.mxu0 }
 0x865   : > { %v1848_v18 = vadd.f32 %v1847_v35, %v1748_v63  ;;  %v1860_v7 = vmax.f32 %v1846_v45, 0.0 }
 0x866   : > { %v1851_v6 = vpop.f32.mrf.mxu0 }
 0x867   : > { %v1852_v8 = vadd.f32 %v1851_v6, %v1753_v36  ;;  %v1861_v40 = vmax.f32 %v1848_v18, 0.0 }
 0x868   : > { %v1853_v42 = vpop.f32.mrf.mxu0 }
 0x869   : > { %v1854_v28 = vadd.f32 %v1853_v42, %v1753_v36  ;;  %v1862_v37 = vmax.f32 %v1852_v8, 0.0  ;;  %v2023_v36 = vpop.permute.xlu1 %2022 }
 0x86b   : > { %v1863_v53 = vmax.f32 %v1854_v28, 0.0 }
 0x86d   : > { %1930 = vmatprep.subr.mxu1 %v1863_v53 }
 0x86e   : > { %1931 = vmatpush1.msra.mxu1 %v1862_v37  ;;  %v2033_v37 = vpop.permute.xlu1 %2032 }
 0x86f   : > { %1932 = vmatprep.subr.mxu1 %v1861_v40 }
 0x870   : > { %1933 = vmatpush1.msra.mxu1 %v1860_v7 }
 0x871   : > { %1934 = vmatprep.subr.mxu1 %v1859_v41 }
 0x872   : > { %1935 = vmatpush1.msra.mxu1 %v1858_v58 }
 0x873   : > { %1936 = vmatprep.subr.mxu1 %v1857_v60 }
 0x874   : > { %1937 = vmatpush1.msra.mxu1 %v1856_v0 }
 0x875   : > { %2299 = vmatmul.mubr.msk.f32.vlgmr.msra.gmra.mxu1 %vm612_vm0, %v2291_v5 }
 0x876   : > { %1976 = vmatprep.mubr.f32.mxu1 %v2376_v13 }
 0x879   : > { %2300 = vmatmul.mubr.msk.f32.gmra.mxu1 %vm612_vm0, %v2292_v44 }
 0x87a   : > { %1982 = vmatprep.mubr.f32.mxu1 %v2376_v13 }
 0x87d   : > { %2301 = vmatmul.mubr.msk.f32.gmra.mxu1 %vm612_vm0, %v2293_v47 }
 0x87e   : > { %1988 = vmatprep.mubr.f32.mxu1 %v2376_v13 }
 0x881   : > { %2302 = vmatmul.mubr.msk.f32.gmra.mxu1 %vm612_vm0, %v2294_v50 }
 0x935   : > { %v1972_v54 = vpop.f32.mrf.mxu1 }
 0x936   : > { %v1973_v12 = vadd.f32 %v1972_v54, %v1877_v51 }
 0x937   : > { %v1974_v32 = vpop.f32.mrf.mxu1 }
 0x938   : > { %v1975_v20 = vadd.f32 %v1974_v32, %v1877_v51  ;;  %v1995_v2 = vadd.f32 %v1973_v12, %v2948_v4  ;;  %v2377_v51 = vmov 1966171168  }
 0x939   : > { %v1978_v15 = vpop.f32.mrf.mxu1 }
 0x93a   : > { %v1979_v23 = vadd.f32 %v1978_v15, %v1882_v11  ;;  %v1996_v46 = vadd.f32 %v1975_v20, %v2944_v61  ;;  %v2007_v34 = vmax.f32 %v1995_v2, 0.0  ;;  %v2028_v61 = vpop.permute.xlu0 %2027 }
 0x93b   : > { %v1980_v59 = vpop.f32.mrf.mxu1 }
 0x93c   : > { %v1997_v1 = vadd.f32 %v1979_v23, %v2940_v3  ;;  %v1981_v13 = vadd.f32 %v1980_v59, %v1882_v11  ;;  %v2008_v3 = vmax.f32 %v1996_v46, 0.0  ;;  %v2035_v28 = vmul.f32 %v2018_v26, %v2007_v34 }
 0x93d   : > { %v1984_v9 = vpop.f32.mrf.mxu1 }
 0x93e   : > { %v1998_v10 = vadd.f32 %v1981_v13, %v2936_v22  ;;  %v1985_v27 = vadd.f32 %v1984_v9, %v1887_v56  ;;  %v2009_v19 = vmax.f32 %v1997_v1, 0.0  ;;  %v2065_v32 = vpop.permute.xlu0 %2064 }
 0x93f   : > { %v1986_v29 = vpop.f32.mrf.mxu1  ;;  %v2070_v23 = vrot.slane %v2065_v32, %v2597_v55 }
 0x940   : > { %v2010_v30 = vmax.f32 %v1998_v10, 0.0  ;;  %v1999_v24 = vadd.f32 %v1985_v27, %v2933_v21  ;;  %v1987_v31 = vadd.f32 %v1986_v29, %v1887_v56  ;;  %v2037_v63 = vmul.f32 %v2023_v36, %v2009_v19 }
 0x941   : > { %v1990_v39 = vpop.f32.mrf.mxu1  ;;  %v2036_v21 = vmul.f32 %v2018_v26, %v2008_v3 }
 0x942   : > { %v2011_v35 = vmax.f32 %v1999_v24, 0.0  ;;  %v2000_v4 = vadd.f32 %v1987_v31, %v2927_v16  ;;  %v1991_v6 = vadd.f32 %v1990_v39, %v1892_v62  ;;  %v2038_v42 = vmul.f32 %v2023_v36, %v2010_v30 }
 0x943   : > { %v1992_v8 = vpop.f32.mrf.mxu1  ;;  %v2043_v25 = vadd.f32 %v2037_v63, %v2035_v28 }
 0x944   : > { %v2012_v22 = vmax.f32 %v2000_v4, 0.0  ;;  %v1993_v18 = vadd.f32 %v1992_v8, %v1892_v62  ;;  %v2039_v43 = vmul.f32 %v2028_v61, %v2011_v35  ;;  %v2001_v45 = vadd.f32 %v1991_v6, %v2924_v14 }
 0x945   : > { %v2052_v38 = vadd.f32 %v2038_v42, %v2036_v21 }
 0x946   : > { %v2040_v48 = vmul.f32 %v2028_v61, %v2012_v22  ;;  %v2002_v53 = vadd.f32 %v1993_v18, %v2930_v17  ;;  %v2013_v33 = vmax.f32 %v2001_v45, 0.0  ;;  %v2044_v40 = vadd.f32 %v2043_v25, %v2039_v43 }
 0x947   : > { %v2077_v17 = vunpack.c.l.s4 %v2377_v51 }
 0x948   : > { %v2014_v16 = vmax.f32 %v2002_v53, 0.0  ;;  %v2041_v57 = vmul.f32 %v2033_v37, %v2013_v33  ;;  %v2053_v7 = vadd.f32 %v2052_v38, %v2040_v48 }
 0x949   : > { %v2078_v15 = vunpack.c.0.s8 %v2077_v17 }
 0x94a   : > { %v2042_v41 = vmul.f32 %v2033_v37, %v2014_v16  ;;  %v2045_v58 = vadd.f32 %v2044_v40, %v2041_v57 }
 0x94b   : > { %v2081_v13 = vsub.s32 %v2078_v15, %v2585_v52 }
 0x94c   : > { %v2054_v60 = vadd.f32 %v2053_v7, %v2042_v41  ;;  %v2046_v0 = vrot.slane %v2045_v58, 4 }
 0x94e   : > { %v2055_v5 = vrot.slane %v2054_v60, 4  ;;  %v2047_v44 = vadd.f32 %v2046_v0, %v2045_v58 }
 0x950   : > { %v2056_v47 = vadd.f32 %v2055_v5, %v2054_v60  ;;  %v2048_v14 = vrot.slane %v2047_v44, 2 }
 0x952   : > { %v2057_v50 = vrot.slane %v2056_v47, 2  ;;  %v2049_v54 = vadd.f32 %v2048_v14, %v2047_v44 }
 0x954   : > { %v2058_v11 = vadd.f32 %v2057_v50, %v2056_v47  ;;  %v2050_v56 = vrot.slane %v2049_v54, 1 }
 0x956   : > { %v2059_v12 = vrot.slane %v2058_v11, 1  ;;  %v2051_v20 = vadd.f32 %v2050_v56, %v2049_v54 }
 0x958   : > { %v2060_v59 = vadd.f32 %v2059_v12, %v2058_v11  ;;  %v2071_v62 = vadd.f32 %v2070_v23, %v2051_v20 }
 0x95a   : > { %v2072_v1 = vadd.f32 %v2070_v23, %v2060_v59 }
 0x95c   : > { %v2075_v2 = vcombine.low %v2071_v62, %v2072_v1 }
 0x95e   : > { %v2082_v9 = vrot.slane %v2075_v2, %v2081_v13 }
 0x960   : > { %v2089_v26 = vrot.slane %v2082_v9, %v2081_v13 }
 0x962   : > { %2095 = vst.msk [vmem:[%s390_s21] sm:$0x3] %vm2093_vm1, %v2089_v26 }
 0x963 PF: > { %s21_s13 = sadd.s32 1, %s2371_s13   ;;  %s3027_s11 = smov %s2367_s12 }
 0x964   : > { %p18_p5 = scmp.ge.s32.totalorder %s21_s13, 4   ;;  %s3028_s12 = smov %s3030_s8 }
 0x966   :  { %20 = sbr.rel (!%p18_p5) target bundleno = 3 (0x3), region = 105 }

</bundles_post_ra>
